<compile_context>
chip_gen: v6e
topology: v6e:2x2x1
jax: 0.10.0
libtpu: 0.0.40
codegen_flags: <defaults>
</compile_context>

<pallas_src>
import functools

import jax
import jax.numpy as jnp
import numpy as np
from jax.experimental import pallas as pl
from jax.experimental.pallas import tpu as pltpu


def _round_up(a, b):
    return -(-a // b) * b


def _conv_bn_relu_kernel(x_ref, w_ref, shift_ref, o_ref, *, tile_h, kh, kw, w_out):
    """One grid step = `tile_h` output rows of one image.

    x_ref:     (1, Hp_t, Wp_pad, Cin)   bf16  full padded image (resident across r)
    w_ref:     (kh*kw, Cin, Cout_p)     bf16  BN scale folded in
    shift_ref: (1, Cout_p)              f32   bn shift + folded conv bias
    o_ref:     (tile_h * w_out, Cout_p)       lane-dense output tile
    """
    cin = x_ref.shape[-1]
    wp = x_ref.shape[-2]              # padded width, multiple of 16
    cout_p = o_ref.shape[-1]
    row0 = pl.multiple_of(pl.program_id(1) * tile_h, tile_h)

    acc = jnp.zeros((tile_h, w_out, cout_p), jnp.float32)
    for dh in range(kh):              # static 3x3 -> fully unrolled
        # Haloed row slab at full padded width: dynamic offset only on a major
        # dim, full extent on the tiled (sublane/lane) dims -> aligned load.
        lhs = x_ref[:, pl.ds(row0 + dh, tile_h), :, :]
        lhs = lhs.reshape(tile_h * wp, cin)          # trivial (wp % 16 == 0)
        for dw in range(kw):
            p = jnp.dot(lhs, w_ref[dh * kw + dw],
                        preferred_element_type=jnp.float32)
            p = p.reshape(tile_h, wp, cout_p)        # trivial split (wp % 8 == 0)
            acc = acc + p[:, dw:dw + w_out, :]       # static f32 window shift
    out = jnp.maximum(acc + shift_ref[...], 0.0)     # folded BN + bias, ReLU
    o_ref[...] = out.reshape(tile_h * w_out, cout_p).astype(o_ref.dtype)


def basic_conv2d(x, conv_w, conv_b, bn_gamma, bn_beta, bn_mean, bn_var,
                 *, eps=1e-5, tile_h=None):
    """Forward of BasicConv2d. x: (N, Cin, H, W) f32. Returns (N, Cout, H, W)."""
    n, cin, h, w = x.shape
    cout, _, kh, kw = conv_w.shape
    pad = kh // 2                                    # stride-1 'same' conv

    # ---- lane/sublane-friendly padded sizes ----
    cout_p = _round_up(cout, 128)                    # lane-dense channels
    w_out = _round_up(w, 8)                          # sublane-friendly out width
    wp_pad = _round_up(max(w + 2 * pad, w_out + kw - 1), 16)

    if tile_h is None:                               # ~256 MXU rows per grid step
        tile_h = max(1, min(h, 256 // wp_pad))
    n_rt = -(-h // tile_h)
    h_t = n_rt * tile_h                              # padded output height
    hp_t = h_t + 2 * pad

    # ---- fold BN(eval) + conv bias into weights/shift ----
    scale = bn_gamma / jnp.sqrt(bn_var + eps)                       # (Cout,)
    shift = bn_beta - bn_mean * scale + conv_b * scale              # (Cout,)
    w_t = jnp.transpose(conv_w, (2, 3, 1, 0)) * scale[None, None, None, :]
    w_t = w_t.reshape(kh * kw, cin, cout)
    w_t = jnp.pad(w_t, ((0, 0), (0, 0), (0, cout_p - cout))).astype(jnp.bfloat16)
    shift_row = jnp.pad(shift, (0, cout_p - cout)).reshape(1, cout_p)
    shift_row = shift_row.astype(jnp.float32)

    # ---- NCHW -> padded NHWC, bf16 activation stream (no 9x im2col blow-up) ----
    xp = jnp.transpose(x, (0, 2, 3, 1))                             # (N, H, W, Cin)
    xp = jnp.pad(xp, ((0, 0),
                      (pad, pad + (h_t - h)),
                      (pad, wp_pad - w - pad),
                      (0, 0))).astype(jnp.bfloat16)                 # (N, Hp_t, Wp_pad, Cin)

    kernel = functools.partial(_conv_bn_relu_kernel,
                               tile_h=tile_h, kh=kh, kw=kw, w_out=w_out)

    flops = 2 * n * n_rt * kh * kw * (tile_h * wp_pad) * cin * cout_p
    bytes_accessed = (xp.size * 2 + w_t.size * 2 + shift_row.size * 4
                      + n * h_t * w_out * cout_p * 4)

    out_flat = pl.pallas_call(
        kernel,
        out_shape=jax.ShapeDtypeStruct((n * h_t * w_out, cout_p), x.dtype),
        grid_spec=pltpu.PrefetchScalarGridSpec(
            num_scalar_prefetch=0,
            grid=(n, n_rt),
            in_specs=[
                # full padded image of batch b; block index constant across r,
                # so it is fetched once per image and stays resident in VMEM.
                pl.BlockSpec((1, hp_t, wp_pad, cin), lambda b, r: (b, 0, 0, 0)),
                pl.BlockSpec((kh * kw, cin, cout_p), lambda b, r: (0, 0, 0)),
                pl.BlockSpec((1, cout_p), lambda b, r: (0, 0)),
            ],
            out_specs=pl.BlockSpec((tile_h * w_out, cout_p),
                                   lambda b, r: (b * n_rt + r, 0)),
        ),
        compiler_params=pltpu.CompilerParams(
            dimension_semantics=("parallel", "parallel"),
            vmem_limit_bytes=32 * 1024 * 1024),
        cost_estimate=pl.CostEstimate(flops=flops, transcendentals=0,
                                      bytes_accessed=bytes_accessed),
    )(xp, w_t, shift_row)

    # strip channel/width/height padding; NCHW kept for parity with the
    # PyTorch module (skip this transpose if the consumer accepts NHWC).
    out = out_flat.reshape(n, h_t, w_out, cout_p)[:, :h, :w, :cout]
    return jnp.transpose(out, (0, 3, 1, 2))


def _reference(x, conv_w, conv_b, g, b, mean, var, eps=1e-5):
    y = jax.lax.conv_general_dilated(
        x, conv_w, window_strides=(1, 1), padding="SAME",
        dimension_numbers=("NCHW", "OIHW", "NCHW"))
    y = y + conv_b[None, :, None, None]
    y = (y - mean[None, :, None, None]) / jnp.sqrt(var[None, :, None, None] + eps)
    y = y * g[None, :, None, None] + b[None, :, None, None]
    return jnp.maximum(y, 0.0)


if __name__ == "__main__":
    key = jax.random.PRNGKey(0)
    kx, kw_, kb, kg, kbe, km, kv = jax.random.split(key, 7)

    N, Cin, H, W = 2, 4, 16, 16
    Cout, KH, KW = 8, 3, 3

    x = jax.random.normal(kx, (N, Cin, H, W), dtype=jnp.float32)
    conv_w = 0.1 * jax.random.normal(kw_, (Cout, Cin, KH, KW), dtype=jnp.float32)
    conv_b = 0.05 * jax.random.normal(kb, (Cout,), dtype=jnp.float32)
    bn_gamma = 1.0 + 0.1 * jax.random.normal(kg, (Cout,), dtype=jnp.float32)
    bn_beta = 0.1 * jax.random.normal(kbe, (Cout,), dtype=jnp.float32)
    bn_mean = 0.1 * jax.random.normal(km, (Cout,), dtype=jnp.float32)
    bn_var = jnp.abs(jax.random.normal(kv, (Cout,), dtype=jnp.float32)) + 0.5

    out = basic_conv2d(x, conv_w, conv_b, bn_gamma, bn_beta, bn_mean, bn_var)
    out = jax.block_until_ready(out)

    ref = _reference(x, conv_w, conv_b, bn_gamma, bn_beta, bn_mean, bn_var)
    # bf16 operands on the MXU (f32 accumulation) -> relaxed tolerance.
    np.testing.assert_allclose(np.asarray(out), np.asarray(ref), rtol=2e-2, atol=2e-2)

    print("KERNEL_OK")
</pallas_src>

<mosaic_0001>
module attributes {stable_mosaic.version = 11 : i64} {
  func.func @_conv_bn_relu_kernel(%arg0: i32, %arg1: i32, %arg2: memref<1x18x32x4xbf16, #tpu.memory_space<vmem>>, %arg3: memref<9x4x128xbf16, #tpu.memory_space<vmem>>, %arg4: memref<1x128xf32, #tpu.memory_space<vmem>>, %arg5: memref<128x128xf32, #tpu.memory_space<vmem>>) attributes {dimension_semantics = [#tpu.dimension_semantics<parallel>, #tpu.dimension_semantics<parallel>], iteration_bounds = array<i64: 2, 2>, scalar_prefetch = 0 : i64, scratch_operands = 0 : i64, tpu.core_type = #tpu.core_type<tc>, window_params = [{transform_indices = @transform_0, window_bounds = array<i64: 1, 18, 32, 4>}, {pipeline_mode = #tpu.pipeline_mode<synchronous>, transform_indices = @transform_1, window_bounds = array<i64: 9, 4, 128>}, {pipeline_mode = #tpu.pipeline_mode<synchronous>, transform_indices = @transform_2, window_bounds = array<i64: 1, 128>}, {transform_indices = @transform_3, window_bounds = array<i64: 128, 128>}]} {
    %c8_i32 = arith.constant 8 : i32
    %0 = arith.muli %arg1, %c8_i32 : i32
    %1 = tpu.assume_multiple %0, 8 : i32
    %cst = arith.constant 0.000000e+00 : f32
    %2 = vector.broadcast %cst : f32 to vector<8x16x128xf32>
    %c0_i32 = arith.constant 0 : i32
    %3 = arith.addi %1, %c0_i32 : i32
    %c0 = arith.constant 0 : index
    %4 = arith.index_cast %3 : i32 to index
    %c0_0 = arith.constant 0 : index
    %c0_1 = arith.constant 0 : index
    %5 = vector.load %arg2[%c0, %4, %c0_0, %c0_1] : memref<1x18x32x4xbf16, #tpu.memory_space<vmem>>, vector<1x8x32x4xbf16>
    %6 = vector.shape_cast %5 : vector<1x8x32x4xbf16> to vector<256x4xbf16>
    %c0_2 = arith.constant 0 : index
    %c0_3 = arith.constant 0 : index
    %c0_4 = arith.constant 0 : index
    %7 = vector.load %arg3[%c0_2, %c0_3, %c0_4] : memref<9x4x128xbf16, #tpu.memory_space<vmem>>, vector<1x4x128xbf16>
    %8 = vector.shape_cast %7 : vector<1x4x128xbf16> to vector<4x128xbf16>
    %cst_5 = arith.constant dense<0.000000e+00> : vector<256x128xf32>
    %9 = tpu.matmul %6, %8, %cst_5 {dimension_numbers = #tpu.dot_dimension_numbers<[1], [0], [0], [1], [0, 0, 1, 1], [], []>} : vector<256x4xbf16>, vector<4x128xbf16>, vector<256x128xf32> -> vector<256x128xf32>
    %10 = vector.shape_cast %9 : vector<256x128xf32> to vector<8x32x128xf32>
    %11 = vector.extract_strided_slice %10 {offsets = [0, 0, 0], sizes = [8, 16, 128], strides = [1, 1, 1]} : vector<8x32x128xf32> to vector<8x16x128xf32>
    %12 = arith.addf %2, %11 : vector<8x16x128xf32>
    %c1 = arith.constant 1 : index
    %c0_6 = arith.constant 0 : index
    %c0_7 = arith.constant 0 : index
    %13 = vector.load %arg3[%c1, %c0_6, %c0_7] : memref<9x4x128xbf16, #tpu.memory_space<vmem>>, vector<1x4x128xbf16>
    %14 = vector.shape_cast %13 : vector<1x4x128xbf16> to vector<4x128xbf16>
    %cst_8 = arith.constant dense<0.000000e+00> : vector<256x128xf32>
    %15 = tpu.matmul %6, %14, %cst_8 {dimension_numbers = #tpu.dot_dimension_numbers<[1], [0], [0], [1], [0, 0, 1, 1], [], []>} : vector<256x4xbf16>, vector<4x128xbf16>, vector<256x128xf32> -> vector<256x128xf32>
    %16 = vector.shape_cast %15 : vector<256x128xf32> to vector<8x32x128xf32>
    %17 = vector.extract_strided_slice %16 {offsets = [0, 1, 0], sizes = [8, 16, 128], strides = [1, 1, 1]} : vector<8x32x128xf32> to vector<8x16x128xf32>
    %18 = arith.addf %12, %17 : vector<8x16x128xf32>
    %c2 = arith.constant 2 : index
    %c0_9 = arith.constant 0 : index
    %c0_10 = arith.constant 0 : index
    %19 = vector.load %arg3[%c2, %c0_9, %c0_10] : memref<9x4x128xbf16, #tpu.memory_space<vmem>>, vector<1x4x128xbf16>
    %20 = vector.shape_cast %19 : vector<1x4x128xbf16> to vector<4x128xbf16>
    %cst_11 = arith.constant dense<0.000000e+00> : vector<256x128xf32>
    %21 = tpu.matmul %6, %20, %cst_11 {dimension_numbers = #tpu.dot_dimension_numbers<[1], [0], [0], [1], [0, 0, 1, 1], [], []>} : vector<256x4xbf16>, vector<4x128xbf16>, vector<256x128xf32> -> vector<256x128xf32>
    %22 = vector.shape_cast %21 : vector<256x128xf32> to vector<8x32x128xf32>
    %23 = vector.extract_strided_slice %22 {offsets = [0, 2, 0], sizes = [8, 16, 128], strides = [1, 1, 1]} : vector<8x32x128xf32> to vector<8x16x128xf32>
    %24 = arith.addf %18, %23 : vector<8x16x128xf32>
    %c1_i32 = arith.constant 1 : i32
    %25 = arith.addi %1, %c1_i32 : i32
    %c0_12 = arith.constant 0 : index
    %26 = arith.index_cast %25 : i32 to index
    %c0_13 = arith.constant 0 : index
    %c0_14 = arith.constant 0 : index
    %27 = vector.load %arg2[%c0_12, %26, %c0_13, %c0_14] : memref<1x18x32x4xbf16, #tpu.memory_space<vmem>>, vector<1x8x32x4xbf16>
    %28 = vector.shape_cast %27 : vector<1x8x32x4xbf16> to vector<256x4xbf16>
    %c3 = arith.constant 3 : index
    %c0_15 = arith.constant 0 : index
    %c0_16 = arith.constant 0 : index
    %29 = vector.load %arg3[%c3, %c0_15, %c0_16] : memref<9x4x128xbf16, #tpu.memory_space<vmem>>, vector<1x4x128xbf16>
    %30 = vector.shape_cast %29 : vector<1x4x128xbf16> to vector<4x128xbf16>
    %cst_17 = arith.constant dense<0.000000e+00> : vector<256x128xf32>
    %31 = tpu.matmul %28, %30, %cst_17 {dimension_numbers = #tpu.dot_dimension_numbers<[1], [0], [0], [1], [0, 0, 1, 1], [], []>} : vector<256x4xbf16>, vector<4x128xbf16>, vector<256x128xf32> -> vector<256x128xf32>
    %32 = vector.shape_cast %31 : vector<256x128xf32> to vector<8x32x128xf32>
    %33 = vector.extract_strided_slice %32 {offsets = [0, 0, 0], sizes = [8, 16, 128], strides = [1, 1, 1]} : vector<8x32x128xf32> to vector<8x16x128xf32>
    %34 = arith.addf %24, %33 : vector<8x16x128xf32>
    %c4 = arith.constant 4 : index
    %c0_18 = arith.constant 0 : index
    %c0_19 = arith.constant 0 : index
    %35 = vector.load %arg3[%c4, %c0_18, %c0_19] : memref<9x4x128xbf16, #tpu.memory_space<vmem>>, vector<1x4x128xbf16>
    %36 = vector.shape_cast %35 : vector<1x4x128xbf16> to vector<4x128xbf16>
    %cst_20 = arith.constant dense<0.000000e+00> : vector<256x128xf32>
    %37 = tpu.matmul %28, %36, %cst_20 {dimension_numbers = #tpu.dot_dimension_numbers<[1], [0], [0], [1], [0, 0, 1, 1], [], []>} : vector<256x4xbf16>, vector<4x128xbf16>, vector<256x128xf32> -> vector<256x128xf32>
    %38 = vector.shape_cast %37 : vector<256x128xf32> to vector<8x32x128xf32>
    %39 = vector.extract_strided_slice %38 {offsets = [0, 1, 0], sizes = [8, 16, 128], strides = [1, 1, 1]} : vector<8x32x128xf32> to vector<8x16x128xf32>
    %40 = arith.addf %34, %39 : vector<8x16x128xf32>
    %c5 = arith.constant 5 : index
    %c0_21 = arith.constant 0 : index
    %c0_22 = arith.constant 0 : index
    %41 = vector.load %arg3[%c5, %c0_21, %c0_22] : memref<9x4x128xbf16, #tpu.memory_space<vmem>>, vector<1x4x128xbf16>
    %42 = vector.shape_cast %41 : vector<1x4x128xbf16> to vector<4x128xbf16>
    %cst_23 = arith.constant dense<0.000000e+00> : vector<256x128xf32>
    %43 = tpu.matmul %28, %42, %cst_23 {dimension_numbers = #tpu.dot_dimension_numbers<[1], [0], [0], [1], [0, 0, 1, 1], [], []>} : vector<256x4xbf16>, vector<4x128xbf16>, vector<256x128xf32> -> vector<256x128xf32>
    %44 = vector.shape_cast %43 : vector<256x128xf32> to vector<8x32x128xf32>
    %45 = vector.extract_strided_slice %44 {offsets = [0, 2, 0], sizes = [8, 16, 128], strides = [1, 1, 1]} : vector<8x32x128xf32> to vector<8x16x128xf32>
    %46 = arith.addf %40, %45 : vector<8x16x128xf32>
    %c2_i32 = arith.constant 2 : i32
    %47 = arith.addi %1, %c2_i32 : i32
    %c0_24 = arith.constant 0 : index
    %48 = arith.index_cast %47 : i32 to index
    %c0_25 = arith.constant 0 : index
    %c0_26 = arith.constant 0 : index
    %49 = vector.load %arg2[%c0_24, %48, %c0_25, %c0_26] : memref<1x18x32x4xbf16, #tpu.memory_space<vmem>>, vector<1x8x32x4xbf16>
    %50 = vector.shape_cast %49 : vector<1x8x32x4xbf16> to vector<256x4xbf16>
    %c6 = arith.constant 6 : index
    %c0_27 = arith.constant 0 : index
    %c0_28 = arith.constant 0 : index
    %51 = vector.load %arg3[%c6, %c0_27, %c0_28] : memref<9x4x128xbf16, #tpu.memory_space<vmem>>, vector<1x4x128xbf16>
    %52 = vector.shape_cast %51 : vector<1x4x128xbf16> to vector<4x128xbf16>
    %cst_29 = arith.constant dense<0.000000e+00> : vector<256x128xf32>
    %53 = tpu.matmul %50, %52, %cst_29 {dimension_numbers = #tpu.dot_dimension_numbers<[1], [0], [0], [1], [0, 0, 1, 1], [], []>} : vector<256x4xbf16>, vector<4x128xbf16>, vector<256x128xf32> -> vector<256x128xf32>
    %54 = vector.shape_cast %53 : vector<256x128xf32> to vector<8x32x128xf32>
    %55 = vector.extract_strided_slice %54 {offsets = [0, 0, 0], sizes = [8, 16, 128], strides = [1, 1, 1]} : vector<8x32x128xf32> to vector<8x16x128xf32>
    %56 = arith.addf %46, %55 : vector<8x16x128xf32>
    %c7 = arith.constant 7 : index
    %c0_30 = arith.constant 0 : index
    %c0_31 = arith.constant 0 : index
    %57 = vector.load %arg3[%c7, %c0_30, %c0_31] : memref<9x4x128xbf16, #tpu.memory_space<vmem>>, vector<1x4x128xbf16>
    %58 = vector.shape_cast %57 : vector<1x4x128xbf16> to vector<4x128xbf16>
    %cst_32 = arith.constant dense<0.000000e+00> : vector<256x128xf32>
    %59 = tpu.matmul %50, %58, %cst_32 {dimension_numbers = #tpu.dot_dimension_numbers<[1], [0], [0], [1], [0, 0, 1, 1], [], []>} : vector<256x4xbf16>, vector<4x128xbf16>, vector<256x128xf32> -> vector<256x128xf32>
    %60 = vector.shape_cast %59 : vector<256x128xf32> to vector<8x32x128xf32>
    %61 = vector.extract_strided_slice %60 {offsets = [0, 1, 0], sizes = [8, 16, 128], strides = [1, 1, 1]} : vector<8x32x128xf32> to vector<8x16x128xf32>
    %62 = arith.addf %56, %61 : vector<8x16x128xf32>
    %c8 = arith.constant 8 : index
    %c0_33 = arith.constant 0 : index
    %c0_34 = arith.constant 0 : index
    %63 = vector.load %arg3[%c8, %c0_33, %c0_34] : memref<9x4x128xbf16, #tpu.memory_space<vmem>>, vector<1x4x128xbf16>
    %64 = vector.shape_cast %63 : vector<1x4x128xbf16> to vector<4x128xbf16>
    %cst_35 = arith.constant dense<0.000000e+00> : vector<256x128xf32>
    %65 = tpu.matmul %50, %64, %cst_35 {dimension_numbers = #tpu.dot_dimension_numbers<[1], [0], [0], [1], [0, 0, 1, 1], [], []>} : vector<256x4xbf16>, vector<4x128xbf16>, vector<256x128xf32> -> vector<256x128xf32>
    %66 = vector.shape_cast %65 : vector<256x128xf32> to vector<8x32x128xf32>
    %67 = vector.extract_strided_slice %66 {offsets = [0, 2, 0], sizes = [8, 16, 128], strides = [1, 1, 1]} : vector<8x32x128xf32> to vector<8x16x128xf32>
    %68 = arith.addf %62, %67 : vector<8x16x128xf32>
    %c0_36 = arith.constant 0 : index
    %c0_37 = arith.constant 0 : index
    %69 = vector.load %arg4[%c0_36, %c0_37] : memref<1x128xf32, #tpu.memory_space<vmem>>, vector<1x128xf32>
    %70 = vector.shape_cast %69 : vector<1x128xf32> to vector<1x1x128xf32>
    %71 = vector.broadcast %70 : vector<1x1x128xf32> to vector<8x16x128xf32>
    %72 = arith.addf %68, %71 : vector<8x16x128xf32>
    %cst_38 = arith.constant 0.000000e+00 : f32
    %73 = vector.broadcast %cst_38 : f32 to vector<8x16x128xf32>
    %74 = arith.maximumf %72, %73 : vector<8x16x128xf32>
    %75 = vector.shape_cast %74 : vector<8x16x128xf32> to vector<128x128xf32>
    %c0_39 = arith.constant 0 : index
    %c0_40 = arith.constant 0 : index
    %76 = vector.load %arg5[%c0_39, %c0_40] : memref<128x128xf32, #tpu.memory_space<vmem>>, vector<128x128xf32>
    tpu.vector_store %arg5[%c0_39, %c0_40], %75 {strides = array<i32>} : memref<128x128xf32, #tpu.memory_space<vmem>>, vector<128x128xf32>,
    return
  }
  func.func @transform_0(%arg0: i32, %arg1: i32) -> (i32, i32, i32, i32) {
    %c0_i32 = arith.constant 0 : i32
    %c0_i32_0 = arith.constant 0 : i32
    %c0_i32_1 = arith.constant 0 : i32
    %c0_i32_2 = arith.constant 0 : i32
    return %arg0, %c0_i32, %c0_i32_0, %c0_i32_1 : i32, i32, i32, i32
  }
  func.func @transform_1(%arg0: i32, %arg1: i32) -> (i32, i32, i32) {
    %c0_i32 = arith.constant 0 : i32
    %c0_i32_0 = arith.constant 0 : i32
    %c0_i32_1 = arith.constant 0 : i32
    %c0_i32_2 = arith.constant 0 : i32
    return %c0_i32, %c0_i32_0, %c0_i32_1 : i32, i32, i32
  }
  func.func @transform_2(%arg0: i32, %arg1: i32) -> (i32, i32) {
    %c0_i32 = arith.constant 0 : i32
    %c0_i32_0 = arith.constant 0 : i32
    %c0_i32_1 = arith.constant 0 : i32
    return %c0_i32, %c0_i32_0 : i32, i32
  }
  func.func @transform_3(%arg0: i32, %arg1: i32) -> (i32, i32) {
    %c2_i32 = arith.constant 2 : i32
    %0 = arith.muli %arg0, %c2_i32 : i32
    %1 = arith.addi %0, %arg1 : i32
    %c0_i32 = arith.constant 0 : i32
    %c0_i32_0 = arith.constant 0 : i32
    return %1, %c0_i32 : i32, i32
  }
}

</mosaic_0001>

<bundles_post_ra>
// kernel: tpu_custom_call.1
= control target key start
LH: loop header
LB: loop body
LE: loop exit
PB: predicated region body
PF: predicated region fallthrough
CT: control target
= control target key end

     0   :  { %8 = vsyncpa [#allocation3], 0  ;;  %s4684_s0 = inlined_call_operand.vmem [shape: bf16[2,18,32,4], index: 0, kind: input, shape index: {}]   ;;  %s4685_s1 = inlined_call_operand.vmem [shape: bf16[9,4,128], index: 1, kind: input, shape index: {}]   ;;  %s4686_s2 = inlined_call_operand.vmem [shape: f32[1,128], index: 2, kind: input, shape index: {}]   ;;  %s4687_s3 = inlined_call_operand.hbm [shape: f32[512,128], index: 3, kind: output, shape index: {}]  }
   0x1   :  { %10 = vsyncpa [#allocation3 + $0x1], 0  ;;  %s3864_s12 = smov 0   ;;  %s3866_s13 = smov 0  }
   0x2   :  { %s3868_s14 = smov 0   ;;  %s3870_s15 = smov 0  }
   0x3   :  { %s3872_s16 = smov 0   ;;  %s3874_s17 = smov 0  }
   0x4   :  { %s3876_s18 = smov 0   ;;  %s3878_s19 = smov 0  }
   0x5 LB: > { %s2862_s20 = sadd.s32 4294967295, %s3839_s19   ;;  %s25_s21 = sadd.s32 1, %s3831_s17  ;;  %s3839_s19 = sphi %s3878_s19, %s16_s19   ;;  %s3835_s18 = sphi %s3876_s18, %s4696_s18   ;;  %s3831_s17 = sphi %s3874_s17, %s4695_s17   ;;  %s3827_s16 = sphi %s3872_s16, %s4694_s16   ;;  %s3823_s15 = sphi %s3870_s15, %s4693_s15   ;;  %s3819_s14 = sphi %s3868_s14, %s4692_s14   ;;  %s3815_s13 = sphi %s3866_s13, %s4691_s13   ;;  %s3811_s12 = sphi %s3864_s12, %s4690_s12  }
   0x6   : > { %s28_s22 = sadd.s32 1, %s3835_s18  ;;  %p26_p0 = scmp.ge.s32.totalorder %s25_s21, 2 }
   0x7   : > { %s2864_s23 = sshll.u32 %s3835_s18, 1  ;;  %s2863_s24 = sadd.s32 4294967294, %s3839_s19  }
   0x8   : > { %s101_s25 = sadd.s32 %s3831_s17, %s2864_s23  ;;  %s4698_s21 = smov (%p26_p0, %s25_s21), 0 }
   0x9   : > { %s4700_s22 = smov (!%p26_p0, %s28_s22), %s3835_s18  ;;  %p117_p1 = scmp.ne.s32.totalorder %s3819_s14, %s3815_s13 }
   0xa   : > { %p118_p2 = scmp.eq.s32.totalorder %s2862_s20, 3  ;;  %p30_p3 = scmp.ge.s32.totalorder %s4700_s22, 2 }
   0xb   : > { %p123_p4 = scmp.ne.s32.totalorder %s3815_s13, %s3811_s12  ;;  %p124_p6 = scmp.eq.s32.totalorder %s2863_s24, 3 }
   0xc   : > { %p3917_p5 = por %p118_p2, %p117_p1  ;;  %s4702_s22 = smov (%p30_p3, %s4700_s22), 0 }
   0xd   : > { %p3923_p7 = por %p124_p6, %p123_p4  ;;  %p2868_p8 = scmp.ge.s32.totalorder %s3839_s19, 1 }
   0xe   : > { %s2865_s28 = sshll.u32 %s4702_s22, 1  ;;  %p156_p9 = scmp.lt.s32.totalorder %s3839_s19, 5 }
   0xf   : > { %s103_s29 = sadd.s32 %s2865_s28, %s4698_s21  ;;  %s107_s30 = sadd.s32 1, %s3819_s14 }
  0x10   : > { %s104_s4 = ssub.s32 %s101_s25, %s103_s29  ;;  %p157_p10 = pnand %p2868_p8, %p156_p9 }
  0x11   : > { %p105_p11 = scmp.eq.s32.totalorder %s104_s4, 0  ;;  %p180_p12 = scmp.lt.s32.totalorder (!%p157_p10), %s3827_s16, 1 }
  0x12   : > { %160 = sbr.rel (%p157_p10) target bundleno = 536 (0x218), region = 32  ;;  %s3150_s24 = sshll.u32 (!%p157_p10), %s3823_s15, 7 }
  0x13   : > { %s3933_s5 = scalar_select %p105_p11, %s3819_s14, %s107_s30  }
  0x14   : > { %s3144_s8 = sshll.u32 (!%p157_p10), %s3827_s16, 1  ;;  %s3841_s25 = smov (!%p157_p10), [#allocation2]  }
  0x15   : > { %s2770_s9 = sadd.s32 (!%p157_p10), %s3823_s15, %s3144_s8  ;;  %s3751_s28 = sshll.u32 (!%p157_p10), %s3841_s25, 4  ;;  %s3752_s28 = int_to_ptr.vmem [resolvable:$false] %s3751_s28 }
  0x17   : > { %v225_v0 = vld [vmem:[%s4685_s1] sm:$0x3]  ;;  %vm355_vm0 = vcmask 1041408   ;;  %v2906_v2 = vld [vmem:[%s4685_s1 + $0x2] sm:$0x3]  ;;  %s181_s20 = scalar_select %p180_p12, %s3827_s16, 1 }
  0x18   : > { %3616 = vmatprep.subr.msk.bf16.mxu1 %vm355_vm0, %v225_v0  ;;  %3615 = vmatprep.subr.msk.bf16.mxu0 %vm355_vm0, %v225_v0  ;;  %v357_v1 = vsel %vm355_vm0, %v225_v0, 0  ;;  %v2923_v3 = vld [vmem:[%s4685_s1 + $0x4] sm:$0x3]  ;;  %vm306_vm1 = vcmask 31744   ;;  %v2974_v8 = vld [vmem:[%s4685_s1 + $0x6] sm:$0x3] }
  0x19   : > { %3614 = vmatpush3.bf16.msra.mxu1 %v357_v1  ;;  %3308 = vmatpush3.bf16.msra.mxu0 %v357_v1  ;;  %s3625_s23 = smul.u32 288, %s181_s20  ;;  %v778_v7 = vsel %vm355_vm0, %v2923_v3, 0  ;;  %v523_v10 = vsel %vm355_vm0, %v2906_v2, 0  ;;  %v3007_v11 = vld [vmem:[%s4685_s1 + $0x8] sm:$0x3]  ;;  %v1197_v24 = vsel %vm355_vm0, %v2974_v8, 0 }
  0x1a   : > { %3617 = vmatprep.subr.msk.bf16.mxu1 %vm355_vm0, %v2906_v2  ;;  %3618 = vmatprep.subr.msk.bf16.mxu0 %vm355_vm0, %v2923_v3  ;;  %v1363_v25 = vsel %vm355_vm0, %v3007_v11, 0  ;;  %v3024_v26 = vld [vmem:[%s4685_s1 + $0xa] sm:$0x3]  ;;  %v3075_v27 = vld [vmem:[%s4685_s1 + $0xc] sm:$0x3]  ;;  %vm957_vm2 = vcmask 1045504  }
  0x1b   : > { %s184_s29 = scalar_lea.vmem %s4684_s0, %s3625_s23  ;;  %v2035_v30 = vsel %vm355_vm0, %v3075_v27, 0  ;;  %v1617_v32 = vsel %vm355_vm0, %v3024_v26, 0  ;;  %v3108_v33 = vld [vmem:[%s4685_s1 + $0xe] sm:$0x3]  ;;  %v3125_v34 = vld [vmem:[%s4685_s1 + $0x10] sm:$0x3] }
  0x1c   : > { %s3955_s30 = scalar_lea.vmem %s184_s29, %s3150_s24  ;;  %v2455_v50 = vsel %vm355_vm0, %v3125_v34, 0  ;;  %v2201_v51 = vsel %vm355_vm0, %v3108_v33, 0  ;;  %vm702_vm3 = vcmask 1046528   ;;  %s177_s29 = sand.u32 1, %s3815_s13  }
  0x1d   : > { %v3699_v4 = vld [vmem:[%s3955_s30] sm:$0xff]   ;;  %v3701_v6 = vld [vmem:[%s3955_s30 + $0x8] sm:$0xff]   ;;  %v3703_v12 = vld [vmem:[%s3955_s30 + $0x10] sm:$0xff]   ;;  %s2869_s6 = sshll.u32 %s177_s29, 7  ;;  %s3153_s16 = sshll.u32 %s2770_s9, 11 }
  0x1e   : > { %v3959_v5 = vld [vmem:[%s3955_s30 + $0x40] sm:$0xff]   ;;  %3309 = vmatprep.mubr.msk.bf16.mxu0 %vm306_vm1, %v3699_v4  ;;  %v3702_v9 = vld [vmem:[%s3955_s30 + $0x48] sm:$0xff]   ;;  %v3704_v13 = vld [vmem:[%s3955_s30 + $0x50] sm:$0xff]   ;;  %s4549_s7 = scalar_lea.vmem [#allocation2], %s2869_s6  ;;  %s4625_s20 = scalar_lea.hbm %s4687_s3, %s3153_s16 }
  0x1f   : > { %3325 = vmatprep.mubr.msk.bf16.mxu1 %vm306_vm1, %v3959_v5  ;;  %3310 = vmatmul.mubr.msk.bf16.vlgmr.msra.gmra.mxu0 %vm306_vm1, %v3701_v6  ;;  %v3705_v14 = vld [vmem:[%s3955_s30 + $0x18] sm:$0xff]   ;;  %v3707_v16 = vld [vmem:[%s3955_s30 + $0x20] sm:$0xff]   ;;  %v3709_v18 = vld [vmem:[%s3955_s30 + $0x28] sm:$0xff]   ;;  %s2777_s10 = sshll.u32 %s4549_s7, 4  ;;  %s4633_s23 = scalar_lea.sflag [#allocation3], %s177_s29  ;;  %s4627_s10 = int_to_ptr.vmem [resolvable:$true] %s2777_s10 }
  0x20   : > { %3326 = vmatmul.mubr.msk.bf16.vlgmr.msra.gmra.mxu1 %vm306_vm1, %v3702_v9  ;;  %3376 = vmatpush3.bf16.msra.mxu0 %v778_v7  ;;  %v3706_v15 = vld [vmem:[%s3955_s30 + $0x58] sm:$0xff]   ;;  %v3708_v17 = vld [vmem:[%s3955_s30 + $0x60] sm:$0xff]   ;;  %v3710_v19 = vld [vmem:[%s3955_s30 + $0x68] sm:$0xff]   ;;  %s3747_s24 = scalar_lea.vmem %s4627_s10, 2048  ;;  %p3754_p2 = scmp.lt.s32.totalorder %s4627_s10, %s3752_s28 }
  0x21   : > { %3342 = vmatpush3.bf16.msra.mxu1 %v523_v10  ;;  %3313 = vmatprep.mubr.msk.bf16.mxu0 %vm306_vm1, %v3703_v12  ;;  %v3711_v20 = vld [vmem:[%s3955_s30 + $0x30] sm:$0xff]   ;;  %v3713_v22 = vld [vmem:[%s3955_s30 + $0x38] sm:$0xff]   ;;  %v3717_v31 = vld [vmem:[%s3955_s30 + $0x20] sm:$0xff]   ;;  %p3748_p13 = scmp.ne.s32.totalorder %s4627_s10, %s3747_s24 }
  0x22   : > { %3329 = vmatprep.mubr.msk.bf16.mxu1 %vm306_vm1, %v3704_v13  ;;  %3619 = vmatprep.subr.msk.bf16.mxu1 %vm355_vm0, %v2974_v8  ;;  %v3712_v21 = vld [vmem:[%s3955_s30 + $0x70] sm:$0xff]   ;;  %v3714_v23 = vld [vmem:[%s3955_s30 + $0x78] sm:$0xff]   ;;  %v3718_v35 = vld [vmem:[%s3955_s30 + $0x28] sm:$0xff]  }
  0x23   : > { %3620 = vmatprep.subr.msk.bf16.mxu0 %vm355_vm0, %v3007_v11  ;;  %v3715_v28 = vld [vmem:[%s3955_s30 + $0x10] sm:$0xff]   ;;  %v3716_v29 = vld [vmem:[%s3955_s30 + $0x18] sm:$0xff]   ;;  %v3721_v38 = vld [vmem:[%s3955_s30 + $0x40] sm:$0xff]   ;;  %p3749_p0 = pnand %p3748_p13, %p3917_p5 }
  0x24   : > { %v3719_v36 = vld [vmem:[%s3955_s30 + $0x30] sm:$0xff]   ;;  %v3720_v37 = vld [vmem:[%s3955_s30 + $0x38] sm:$0xff]   ;;  %v3722_v39 = vld [vmem:[%s3955_s30 + $0x48] sm:$0xff]  }
  0x25   : > { %v3723_v40 = vld [vmem:[%s3955_s30 + $0x50] sm:$0xff]   ;;  %v3724_v41 = vld [vmem:[%s3955_s30 + $0x58] sm:$0xff]   ;;  %v3725_v42 = vld [vmem:[%s3955_s30 + $0x60] sm:$0xff]   ;;  %p3750_p1 = pneg %p3749_p0 }
  0x26   : > { %v4090_v43 = vld [vmem:[%s3955_s30 + $0x68] sm:$0xff]   ;;  %v4093_v44 = vld [vmem:[%s3955_s30 + $0x70] sm:$0xff]   ;;  %v4104_v45 = vld [vmem:[%s3955_s30 + $0x78] sm:$0xff]  }
  0x27   : > { %3314 = vmatmul.mubr.msk.bf16.gmra.mxu0 %vm306_vm1, %v3705_v14  ;;  %v4107_v46 = vld [vmem:[%s3955_s30 + $0x80] sm:$0xff]   ;;  %v4118_v47 = vld [vmem:[%s3955_s30 + $0x88] sm:$0xff]   ;;  %v4136_v52 = vld [vmem:[%s3955_s30 + $0x30] sm:$0xff]  }
  0x28   : > { %3330 = vmatmul.mubr.msk.bf16.gmra.mxu1 %vm306_vm1, %v3706_v15  ;;  %3317 = vmatprep.mubr.msk.bf16.mxu0 %vm306_vm1, %v3707_v16  ;;  %v4121_v48 = vld [vmem:[%s3955_s30 + $0x20] sm:$0xff]   ;;  %v4131_v49 = vld [vmem:[%s3955_s30 + $0x28] sm:$0xff]   ;;  %v4145_v53 = vld [vmem:[%s3955_s30 + $0x38] sm:$0xff]  }
  0x29   : > { %3333 = vmatprep.mubr.msk.bf16.mxu1 %vm306_vm1, %v3708_v17  ;;  %v4148_v54 = vld [vmem:[%s3955_s30 + $0x40] sm:$0xff]   ;;  %v4157_v55 = vld [vmem:[%s3955_s30 + $0x48] sm:$0xff]   ;;  %v4160_v56 = vld [vmem:[%s3955_s30 + $0x50] sm:$0xff]  }
  0x2a   : > { %v4169_v57 = vld [vmem:[%s3955_s30 + $0x58] sm:$0xff]   ;;  %v4172_v58 = vld [vmem:[%s3955_s30 + $0x60] sm:$0xff]   ;;  %v4181_v59 = vld [vmem:[%s3955_s30 + $0x68] sm:$0xff]  }
  0x2b   : > { %v4184_v60 = vld [vmem:[%s3955_s30 + $0x70] sm:$0xff]   ;;  %v4197_v2 = vld [vmem:[%s3955_s30 + $0x78] sm:$0xff]  }
  0x2f   : > { %3318 = vmatmul.mubr.msk.bf16.gmra.mxu0 %vm306_vm1, %v3709_v18 }
  0x30   : > { %3334 = vmatmul.mubr.msk.bf16.gmra.mxu1 %vm306_vm1, %v3710_v19  ;;  %3321 = vmatprep.mubr.msk.bf16.mxu0 %vm306_vm1, %v3711_v20 }
  0x31   : > { %3337 = vmatprep.mubr.msk.bf16.mxu1 %vm306_vm1, %v3712_v21 }
  0x37   : > { %3322 = vmatmul.mubr.msk.bf16.gmra.mxu0 %vm306_vm1, %v3713_v22 }
  0x38   : > { %3338 = vmatmul.mubr.msk.bf16.gmra.mxu1 %vm306_vm1, %v3714_v23  ;;  %3377 = vmatprep.mubr.msk.bf16.mxu0 %vm306_vm1, %v3699_v4 }
  0x39   : > { %3343 = vmatprep.mubr.msk.bf16.mxu1 %vm306_vm1, %v3699_v4  ;;  %v4200_v4 = vld [vmem:[%s3955_s30 + $0x80] sm:$0xff]  }
  0x3f   : > { %3378 = vmatmul.mubr.msk.bf16.vlgmr.msra.gmra.mxu0 %vm306_vm1, %v3701_v6 }
  0x40   : > { %3344 = vmatmul.mubr.msk.bf16.vlgmr.msra.gmra.mxu1 %vm306_vm1, %v3701_v6  ;;  %3444 = vmatpush3.bf16.msra.mxu0 %v1363_v25 }
  0x41   : > { %3410 = vmatpush3.bf16.msra.mxu1 %v1197_v24  ;;  %3347 = vmatprep.mubr.msk.bf16.mxu1 %vm306_vm1, %v3703_v12 }
  0x42   : > { %3381 = vmatprep.mubr.msk.bf16.mxu0 %vm306_vm1, %v3703_v12  ;;  %3621 = vmatprep.subr.msk.bf16.mxu1 %vm355_vm0, %v3024_v26  ;;  %v4219_v12 = vld [vmem:[%s3955_s30 + $0x88] sm:$0xff]  }
  0x43   : > { %3622 = vmatprep.subr.msk.bf16.mxu0 %vm355_vm0, %v3075_v27 }
  0x47   : > { %3382 = vmatmul.mubr.msk.bf16.gmra.mxu0 %vm306_vm1, %v3705_v14 }
  0x48   : > { %3348 = vmatmul.mubr.msk.bf16.gmra.mxu1 %vm306_vm1, %v3705_v14  ;;  %3385 = vmatprep.mubr.msk.bf16.mxu0 %vm306_vm1, %v3707_v16  ;;  %v4222_v14 = vld [vmem:[%s3955_s30 + $0x90] sm:$0xff]  }
  0x49   : > { %3351 = vmatprep.mubr.msk.bf16.mxu1 %vm306_vm1, %v3707_v16 }
  0x4f   : > { %3386 = vmatmul.mubr.msk.bf16.gmra.mxu0 %vm306_vm1, %v3709_v18 }
  0x50   : > { %3352 = vmatmul.mubr.msk.bf16.gmra.mxu1 %vm306_vm1, %v3709_v18  ;;  %3389 = vmatprep.mubr.msk.bf16.mxu0 %vm306_vm1, %v3711_v20 }
  0x51   : > { %3355 = vmatprep.mubr.msk.bf16.mxu1 %vm306_vm1, %v3711_v20 }
  0x57   : > { %3390 = vmatmul.mubr.msk.bf16.gmra.mxu0 %vm306_vm1, %v3713_v22 }
  0x58   : > { %3356 = vmatmul.mubr.msk.bf16.gmra.mxu1 %vm306_vm1, %v3713_v22  ;;  %3393 = vmatprep.mubr.msk.bf16.mxu0 %vm306_vm1, %v3959_v5  ;;  %v4241_v22 = vld [vmem:[%s3955_s30 + $0x98] sm:$0xff]   ;;  %s3753_s30 = scalar_lea.vmem %s3752_s28, 4096 }
  0x59   : > { %3359 = vmatprep.mubr.msk.bf16.mxu1 %vm306_vm1, %v3959_v5  ;;  %p3755_p3 = scmp.lt.s32.totalorder %s3753_s30, %s3747_s24 }
  0x5b   : > { %p3756_p4 = por %p3755_p3, %p3754_p2 }
  0x5d   : > { %p3757_p6 = pnand %p3756_p4, %p3750_p1 }
  0x5f   : > { %3394 = vmatmul.mubr.msk.bf16.gmra.mxu0 %vm306_vm1, %v3702_v9 }
  0x60   : > { %3360 = vmatmul.mubr.msk.bf16.gmra.mxu1 %vm306_vm1, %v3702_v9  ;;  %3397 = vmatprep.mubr.msk.bf16.mxu0 %vm306_vm1, %v3704_v13 }
  0x61   : > { %3363 = vmatprep.mubr.msk.bf16.mxu1 %vm306_vm1, %v3704_v13 }
  0x67   : > { %3398 = vmatmul.mubr.msk.bf16.gmra.mxu0 %vm306_vm1, %v3706_v15 }
  0x68   : > { %3364 = vmatmul.mubr.msk.bf16.gmra.mxu1 %vm306_vm1, %v3706_v15  ;;  %3401 = vmatprep.mubr.msk.bf16.mxu0 %vm306_vm1, %v3708_v17 }
  0x69   : > { %3367 = vmatprep.mubr.msk.bf16.mxu1 %vm306_vm1, %v3708_v17 }
  0x6f   : > { %3402 = vmatmul.mubr.msk.bf16.gmra.mxu0 %vm306_vm1, %v3710_v19 }
  0x70   : > { %3368 = vmatmul.mubr.msk.bf16.gmra.mxu1 %vm306_vm1, %v3710_v19  ;;  %3405 = vmatprep.mubr.msk.bf16.mxu0 %vm306_vm1, %v3712_v21 }
  0x71   : > { %3371 = vmatprep.mubr.msk.bf16.mxu1 %vm306_vm1, %v3712_v21 }
  0x77   : > { %3406 = vmatmul.mubr.msk.bf16.gmra.mxu0 %vm306_vm1, %v3714_v23 }
  0x78   : > { %3372 = vmatmul.mubr.msk.bf16.gmra.mxu1 %vm306_vm1, %v3714_v23  ;;  %3445 = vmatprep.mubr.msk.bf16.mxu0 %vm306_vm1, %v3715_v28 }
  0x79   : > { %3411 = vmatprep.mubr.msk.bf16.mxu1 %vm306_vm1, %v3715_v28 }
  0x7f   : > { %3446 = vmatmul.mubr.msk.bf16.vlgmr.msra.gmra.mxu0 %vm306_vm1, %v3716_v29 }
  0x80   : > { %3412 = vmatmul.mubr.msk.bf16.vlgmr.msra.gmra.mxu1 %vm306_vm1, %v3716_v29  ;;  %3512 = vmatpush3.bf16.msra.mxu0 %v2035_v30 }
  0x81   : > { %3478 = vmatpush3.bf16.msra.mxu1 %v1617_v32  ;;  %3415 = vmatprep.mubr.msk.bf16.mxu1 %vm306_vm1, %v3717_v31 }
  0x82   : > { %3449 = vmatprep.mubr.msk.bf16.mxu0 %vm306_vm1, %v3717_v31  ;;  %3623 = vmatprep.subr.msk.bf16.mxu1 %vm355_vm0, %v3108_v33 }
  0x83   : > { %3624 = vmatprep.subr.msk.bf16.mxu0 %vm355_vm0, %v3125_v34 }
  0x87   : > { %3450 = vmatmul.mubr.msk.bf16.gmra.mxu0 %vm306_vm1, %v3718_v35 }
  0x88   : > { %3416 = vmatmul.mubr.msk.bf16.gmra.mxu1 %vm306_vm1, %v3718_v35  ;;  %3453 = vmatprep.mubr.msk.bf16.mxu0 %vm306_vm1, %v3719_v36 }
  0x89   : > { %3419 = vmatprep.mubr.msk.bf16.mxu1 %vm306_vm1, %v3719_v36 }
  0x8f   : > { %3454 = vmatmul.mubr.msk.bf16.gmra.mxu0 %vm306_vm1, %v3720_v37 }
  0x90   : > { %3420 = vmatmul.mubr.msk.bf16.gmra.mxu1 %vm306_vm1, %v3720_v37  ;;  %3457 = vmatprep.mubr.msk.bf16.mxu0 %vm306_vm1, %v3721_v38 }
  0x91   : > { %3423 = vmatprep.mubr.msk.bf16.mxu1 %vm306_vm1, %v3721_v38 }
  0x97   : > { %3458 = vmatmul.mubr.msk.bf16.gmra.mxu0 %vm306_vm1, %v3722_v39 }
  0x98   : > { %3424 = vmatmul.mubr.msk.bf16.gmra.mxu1 %vm306_vm1, %v3722_v39  ;;  %3461 = vmatprep.mubr.msk.bf16.mxu0 %vm306_vm1, %v3723_v40 }
  0x99   : > { %3427 = vmatprep.mubr.msk.bf16.mxu1 %vm306_vm1, %v3723_v40 }
  0x9f   : > { %3462 = vmatmul.mubr.msk.bf16.gmra.mxu0 %vm306_vm1, %v3724_v41 }
  0xa0   : > { %3428 = vmatmul.mubr.msk.bf16.gmra.mxu1 %vm306_vm1, %v3724_v41  ;;  %3465 = vmatprep.mubr.msk.bf16.mxu0 %vm306_vm1, %v3725_v42 }
  0xa1   : > { %3431 = vmatprep.mubr.msk.bf16.mxu1 %vm306_vm1, %v3725_v42 }
  0xa7   : > { %3466 = vmatmul.mubr.msk.bf16.gmra.mxu0 %vm306_vm1, %v4090_v43 }
  0xa8   : > { %3432 = vmatmul.mubr.msk.bf16.gmra.mxu1 %vm306_vm1, %v4090_v43  ;;  %3469 = vmatprep.mubr.msk.bf16.mxu0 %vm306_vm1, %v4093_v44 }
  0xa9   : > { %3435 = vmatprep.mubr.msk.bf16.mxu1 %vm306_vm1, %v4093_v44 }
  0xaf   : > { %3470 = vmatmul.mubr.msk.bf16.gmra.mxu0 %vm306_vm1, %v4104_v45 }
  0xb0   : > { %3436 = vmatmul.mubr.msk.bf16.gmra.mxu1 %vm306_vm1, %v4104_v45  ;;  %3473 = vmatprep.mubr.msk.bf16.mxu0 %vm306_vm1, %v4107_v46 }
  0xb1   : > { %3439 = vmatprep.mubr.msk.bf16.mxu1 %vm306_vm1, %v4107_v46 }
  0xb7   : > { %3474 = vmatmul.mubr.msk.bf16.gmra.mxu0 %vm306_vm1, %v4118_v47 }
  0xb8   : > { %3440 = vmatmul.mubr.msk.bf16.gmra.mxu1 %vm306_vm1, %v4118_v47  ;;  %3513 = vmatprep.mubr.msk.bf16.mxu0 %vm306_vm1, %v4121_v48 }
  0xb9   : > { %3479 = vmatprep.mubr.msk.bf16.mxu1 %vm306_vm1, %v3715_v28 }
  0xbf   : > { %3514 = vmatmul.mubr.msk.bf16.vlgmr.msra.gmra.mxu0 %vm306_vm1, %v4131_v49 }
  0xc0   : > { %3480 = vmatmul.mubr.msk.bf16.vlgmr.msra.gmra.mxu1 %vm306_vm1, %v3716_v29  ;;  %3580 = vmatpush3.bf16.msra.mxu0 %v2455_v50 }
  0xc1   : > { %3546 = vmatpush3.bf16.msra.mxu1 %v2201_v51  ;;  %3483 = vmatprep.mubr.msk.bf16.mxu1 %vm306_vm1, %v3717_v31 }
  0xc2   : > { %3517 = vmatprep.mubr.msk.bf16.mxu0 %vm306_vm1, %v4136_v52 }
  0xc7   : > { %3518 = vmatmul.mubr.msk.bf16.gmra.mxu0 %vm306_vm1, %v4145_v53 }
  0xc8   : > { %3484 = vmatmul.mubr.msk.bf16.gmra.mxu1 %vm306_vm1, %v3718_v35  ;;  %3521 = vmatprep.mubr.msk.bf16.mxu0 %vm306_vm1, %v4148_v54 }
  0xc9   : > { %3487 = vmatprep.mubr.msk.bf16.mxu1 %vm306_vm1, %v3719_v36 }
  0xcf   : > { %3522 = vmatmul.mubr.msk.bf16.gmra.mxu0 %vm306_vm1, %v4157_v55 }
  0xd0   : > { %3488 = vmatmul.mubr.msk.bf16.gmra.mxu1 %vm306_vm1, %v3720_v37  ;;  %3525 = vmatprep.mubr.msk.bf16.mxu0 %vm306_vm1, %v4160_v56 }
  0xd1   : > { %3491 = vmatprep.mubr.msk.bf16.mxu1 %vm306_vm1, %v3721_v38 }
  0xd7   : > { %3526 = vmatmul.mubr.msk.bf16.gmra.mxu0 %vm306_vm1, %v4169_v57 }
  0xd8   : > { %3492 = vmatmul.mubr.msk.bf16.gmra.mxu1 %vm306_vm1, %v3722_v39  ;;  %3529 = vmatprep.mubr.msk.bf16.mxu0 %vm306_vm1, %v4172_v58 }
  0xd9   : > { %3495 = vmatprep.mubr.msk.bf16.mxu1 %vm306_vm1, %v3723_v40 }
  0xdf   : > { %v3311_v61 = vpop.f32.mrf.mxu0  ;;  %3530 = vmatmul.mubr.msk.bf16.gmra.mxu0 %vm306_vm1, %v4181_v59 }
  0xe0   : > { %v3327_v62 = vpop.f32.mrf.mxu1  ;;  %3496 = vmatmul.mubr.msk.bf16.gmra.mxu1 %vm306_vm1, %v3724_v41  ;;  %3533 = vmatprep.mubr.msk.bf16.mxu0 %vm306_vm1, %v4184_v60 }
  0xe1   : > { %v4191_v63 = vpop.f32.mrf.mxu0  ;;  %3499 = vmatprep.mubr.msk.bf16.mxu1 %vm306_vm1, %v3725_v42 }
  0xe2   : > { %v4194_v0 = vpop.f32.mrf.mxu1 }
  0xe3   : > { %v3312_v1 = vpop.f32.mrf.mxu0 }
  0xe4   : > { %v3328_v3 = vpop.f32.mrf.mxu1 }
  0xe5   : > { %v4202_v5 = vpop.f32.mrf.mxu0 }
  0xe6   : > { %v4204_v6 = vpop.f32.mrf.mxu1 }
  0xe7   : > { %v3315_v7 = vpop.f32.mrf.mxu0  ;;  %3534 = vmatmul.mubr.msk.bf16.gmra.mxu0 %vm306_vm1, %v4197_v2 }
  0xe8   : > { %v3331_v8 = vpop.f32.mrf.mxu1  ;;  %3500 = vmatmul.mubr.msk.bf16.gmra.mxu1 %vm306_vm1, %v4090_v43  ;;  %3537 = vmatprep.mubr.msk.bf16.mxu0 %vm306_vm1, %v4200_v4 }
  0xe9   : > { %v4212_v9 = vpop.f32.mrf.mxu0  ;;  %3503 = vmatprep.mubr.msk.bf16.mxu1 %vm306_vm1, %v4093_v44 }
  0xea   : > { %v4216_v10 = vpop.f32.mrf.mxu1 }
  0xeb   : > { %v3316_v11 = vpop.f32.mrf.mxu0 }
  0xec   : > { %v3332_v13 = vpop.f32.mrf.mxu1 }
  0xed   : > { %v4224_v15 = vpop.f32.mrf.mxu0 }
  0xee   : > { %v4226_v16 = vpop.f32.mrf.mxu1 }
  0xef   : > { %v3319_v17 = vpop.f32.mrf.mxu0  ;;  %3538 = vmatmul.mubr.msk.bf16.gmra.mxu0 %vm306_vm1, %v4219_v12 }
  0xf0   : > { %v3335_v18 = vpop.f32.mrf.mxu1  ;;  %3504 = vmatmul.mubr.msk.bf16.gmra.mxu1 %vm306_vm1, %v4104_v45  ;;  %3541 = vmatprep.mubr.msk.bf16.mxu0 %vm306_vm1, %v4222_v14 }
  0xf1   : > { %v4234_v19 = vpop.f32.mrf.mxu0  ;;  %3507 = vmatprep.mubr.msk.bf16.mxu1 %vm306_vm1, %v4107_v46 }
  0xf2   : > { %v4238_v20 = vpop.f32.mrf.mxu1 }
  0xf3   : > { %v3320_v21 = vpop.f32.mrf.mxu0 }
  0xf4   : > { %v3336_v23 = vpop.f32.mrf.mxu1 }
  0xf5   : > { %v4243_v24 = vpop.f32.mrf.mxu0 }
  0xf6   : > { %v4245_v25 = vpop.f32.mrf.mxu1 }
  0xf7   : > { %v3323_v26 = vpop.f32.mrf.mxu0  ;;  %3542 = vmatmul.mubr.msk.bf16.gmra.mxu0 %vm306_vm1, %v4241_v22 }
  0xf8   : > { %v3339_v27 = vpop.f32.mrf.mxu1  ;;  %3508 = vmatmul.mubr.msk.bf16.gmra.mxu1 %vm306_vm1, %v4118_v47  ;;  %3581 = vmatprep.mubr.msk.bf16.mxu0 %vm306_vm1, %v4121_v48 }
  0xf9   : > { %v4253_v28 = vpop.f32.mrf.mxu0  ;;  %3547 = vmatprep.mubr.msk.bf16.mxu1 %vm306_vm1, %v4121_v48 }
  0xfa   : > { %v4257_v29 = vpop.f32.mrf.mxu1 }
  0xfb   : > { %v3324_v30 = vpop.f32.mrf.mxu0 }
  0xfc   : > { %v3340_v31 = vpop.f32.mrf.mxu1 }
  0xfd   : > { %v4259_v32 = vpop.f32.mrf.mxu0 }
  0xfe   : > { %v4261_v33 = vpop.f32.mrf.mxu1 }
  0xff   : > { %v3379_v34 = vpop.f32.mrf.mxu0  ;;  %3582 = vmatmul.mubr.msk.bf16.vlgmr.msra.gmra.mxu0 %vm306_vm1, %v4131_v49 }
 0x100   : > { %v3345_v35 = vpop.f32.mrf.mxu1  ;;  %3548 = vmatmul.mubr.msk.bf16.vlgmr.msra.gmra.mxu1 %vm306_vm1, %v4131_v49  ;;  %3585 = vmatprep.mubr.msk.bf16.mxu0 %vm306_vm1, %v4136_v52  ;;  %v961_v41 = vrot.slane %v3379_v34, 2 }
 0x101   : > { %v814_v36 = vpop.f32.mrf.mxu0  ;;  %3551 = vmatprep.mubr.msk.bf16.mxu1 %vm306_vm1, %v4136_v52  ;;  %v706_v45 = vrot.slane %v3345_v35, 1 }
 0x102   : > { %v559_v37 = vpop.f32.mrf.mxu1  ;;  %v958_v42 = vrot.slane %v814_v36, 2 }
 0x103   : > { %v3380_v38 = vpop.f32.mrf.mxu0  ;;  %v703_v46 = vrot.slane %v559_v37, 1 }
 0x104   : > { %v3346_v39 = vpop.f32.mrf.mxu1 }
 0x105   : > { %v817_v40 = vpop.f32.mrf.mxu0 }
 0x106   : > { %v562_v43 = vpop.f32.mrf.mxu1  ;;  %v959_v44 = vrot.slane %v817_v40, 2 }
 0x107   : > { %v704_v47 = vrot.slane %v562_v43, 1  ;;  %v3383_v48 = vpop.f32.mrf.mxu0  ;;  %3586 = vmatmul.mubr.msk.bf16.gmra.mxu0 %vm306_vm1, %v4145_v53 }
 0x108   : > { %v3349_v49 = vpop.f32.mrf.mxu1  ;;  %3552 = vmatmul.mubr.msk.bf16.gmra.mxu1 %vm306_vm1, %v4145_v53  ;;  %3589 = vmatprep.mubr.msk.bf16.mxu0 %vm306_vm1, %v4148_v54  ;;  %v960_v50 = vsel %vm957_vm2, %v958_v42, %v959_v44  ;;  %v962_v51 = vsel %vm957_vm2, %v959_v44, %v961_v41  ;;  %v966_v18 = vrot.slane %v3383_v48, 2 }
 0x109   : > { %v829_v52 = vpop.f32.mrf.mxu0  ;;  %3555 = vmatprep.mubr.msk.bf16.mxu1 %vm306_vm1, %v4148_v54  ;;  %v705_v61 = vsel %vm702_vm3, %v703_v46, %v704_v47  ;;  %v707_v62 = vsel %vm702_vm3, %v704_v47, %v706_v45  ;;  %v711_v26 = vrot.slane %v3349_v49, 1 }
 0x10a   : > { %v574_v1 = vpop.f32.mrf.mxu1  ;;  %v759_v3 = vadd.f32 %v705_v61, %v4191_v63  ;;  %v760_v53 = vadd.f32 %v707_v62, %v4202_v5  ;;  %v963_v21 = vrot.slane %v829_v52, 2 }
 0x10b   : > { %v3384_v7 = vpop.f32.mrf.mxu0  ;;  %v708_v27 = vrot.slane %v574_v1, 1 }
 0x10c   : > { %v3350_v8 = vpop.f32.mrf.mxu1  ;;  %v4285_v11 = vadd.f32 %v960_v50, %v759_v3  ;;  %v4287_v13 = vadd.f32 %v962_v51, %v760_v53 }
 0x10d   : > { %v832_v17 = vpop.f32.mrf.mxu0 }
 0x10e   : > { %v577_v23 = vpop.f32.mrf.mxu1  ;;  %v964_v54 = vrot.slane %v832_v17, 2 }
 0x10f   : > { %v709_v30 = vrot.slane %v577_v23, 1  ;;  %v3387_v31 = vpop.f32.mrf.mxu0  ;;  %3590 = vmatmul.mubr.msk.bf16.gmra.mxu0 %vm306_vm1, %v4157_v55 }
 0x110   : > { %v3353_v63 = vpop.f32.mrf.mxu1  ;;  %3556 = vmatmul.mubr.msk.bf16.gmra.mxu1 %vm306_vm1, %v4157_v55  ;;  %3593 = vmatprep.mubr.msk.bf16.mxu0 %vm306_vm1, %v4160_v56  ;;  %v965_v5 = vsel %vm957_vm2, %v963_v21, %v964_v54  ;;  %v967_v34 = vsel %vm957_vm2, %v964_v54, %v966_v18  ;;  %v971_v45 = vrot.slane %v3387_v31, 2 }
 0x111   : > { %v844_v35 = vpop.f32.mrf.mxu0  ;;  %3559 = vmatprep.mubr.msk.bf16.mxu1 %vm306_vm1, %v4160_v56  ;;  %v710_v36 = vsel %vm702_vm3, %v708_v27, %v709_v30  ;;  %v712_v37 = vsel %vm702_vm3, %v709_v30, %v711_v26  ;;  %v716_v48 = vrot.slane %v3353_v63, 1 }
 0x112   : > { %v589_v38 = vpop.f32.mrf.mxu1  ;;  %v761_v39 = vadd.f32 %v710_v36, %v4212_v9  ;;  %v762_v55 = vadd.f32 %v712_v37, %v4224_v15  ;;  %v968_v46 = vrot.slane %v844_v35, 2 }
 0x113   : > { %v3388_v40 = vpop.f32.mrf.mxu0  ;;  %v713_v49 = vrot.slane %v589_v38, 1 }
 0x114   : > { %v3354_v41 = vpop.f32.mrf.mxu1  ;;  %v4303_v42 = vadd.f32 %v965_v5, %v761_v39  ;;  %v4305_v43 = vadd.f32 %v967_v34, %v762_v55 }
 0x115   : > { %v847_v44 = vpop.f32.mrf.mxu0 }
 0x116   : > { %v592_v47 = vpop.f32.mrf.mxu1  ;;  %v969_v56 = vrot.slane %v847_v44, 2 }
 0x117   : > { %v714_v50 = vrot.slane %v592_v47, 1  ;;  %v3391_v51 = vpop.f32.mrf.mxu0  ;;  %3594 = vmatmul.mubr.msk.bf16.gmra.mxu0 %vm306_vm1, %v4169_v57 }
 0x118   : > { %v3357_v9 = vpop.f32.mrf.mxu1  ;;  %3560 = vmatmul.mubr.msk.bf16.gmra.mxu1 %vm306_vm1, %v4169_v57  ;;  %3597 = vmatprep.mubr.msk.bf16.mxu0 %vm306_vm1, %v4172_v58  ;;  %v970_v15 = vsel %vm957_vm2, %v968_v46, %v969_v56  ;;  %v972_v52 = vsel %vm957_vm2, %v969_v56, %v971_v45  ;;  %v976_v23 = vrot.slane %v3391_v51, 2 }
 0x119   : > { %v859_v61 = vpop.f32.mrf.mxu0  ;;  %3563 = vmatprep.mubr.msk.bf16.mxu1 %vm306_vm1, %v4172_v58  ;;  %v715_v62 = vsel %vm702_vm3, %v713_v49, %v714_v50  ;;  %v717_v1 = vsel %vm702_vm3, %v714_v50, %v716_v48  ;;  %v721_v27 = vrot.slane %v3357_v9, 1 }
 0x11a   : > { %v604_v3 = vpop.f32.mrf.mxu1  ;;  %v763_v53 = vadd.f32 %v715_v62, %v4234_v19  ;;  %v764_v57 = vadd.f32 %v717_v1, %v4243_v24  ;;  %v973_v54 = vrot.slane %v859_v61, 2 }
 0x11b   : > { %v3392_v7 = vpop.f32.mrf.mxu0  ;;  %v718_v30 = vrot.slane %v604_v3, 1 }
 0x11c   : > { %v3358_v8 = vpop.f32.mrf.mxu1  ;;  %v4321_v17 = vadd.f32 %v970_v15, %v763_v53  ;;  %v4323_v18 = vadd.f32 %v972_v52, %v764_v57 }
 0x11d   : > { %v862_v21 = vpop.f32.mrf.mxu0 }
 0x11e   : > { %v607_v26 = vpop.f32.mrf.mxu1  ;;  %v974_v58 = vrot.slane %v862_v21, 2 }
 0x11f   : > { %v719_v31 = vrot.slane %v607_v26, 1  ;;  %v3395_v63 = vpop.f32.mrf.mxu0  ;;  %3598 = vmatmul.mubr.msk.bf16.gmra.mxu0 %vm306_vm1, %v4181_v59 }
 0x120   : > { %v3361_v19 = vpop.f32.mrf.mxu1  ;;  %3564 = vmatmul.mubr.msk.bf16.gmra.mxu1 %vm306_vm1, %v4181_v59  ;;  %3601 = vmatprep.mubr.msk.bf16.mxu0 %vm306_vm1, %v4184_v60  ;;  %v975_v24 = vsel %vm957_vm2, %v973_v54, %v974_v58  ;;  %v977_v5 = vsel %vm957_vm2, %v974_v58, %v976_v23  ;;  %v981_v45 = vrot.slane %v3395_v63, 2 }
 0x121   : > { %v874_v34 = vpop.f32.mrf.mxu0  ;;  %3567 = vmatprep.mubr.msk.bf16.mxu1 %vm306_vm1, %v4184_v60  ;;  %v720_v35 = vsel %vm702_vm3, %v718_v30, %v719_v31  ;;  %v722_v36 = vsel %vm702_vm3, %v719_v31, %v721_v27  ;;  %v726_v56 = vrot.slane %v3361_v19, 1 }
 0x122   : > { %v619_v37 = vpop.f32.mrf.mxu1  ;;  %v765_v38 = vadd.f32 %v720_v35, %v4253_v28  ;;  %v766_v59 = vadd.f32 %v722_v36, %v4259_v32  ;;  %v978_v46 = vrot.slane %v874_v34, 2 }
 0x123   : > { %v3396_v39 = vpop.f32.mrf.mxu0  ;;  %v723_v48 = vrot.slane %v619_v37, 1 }
 0x124   : > { %v3362_v55 = vpop.f32.mrf.mxu1  ;;  %v4339_v40 = vadd.f32 %v975_v24, %v765_v38  ;;  %v4341_v41 = vadd.f32 %v977_v5, %v766_v59 }
 0x125   : > { %v877_v44 = vpop.f32.mrf.mxu0 }
 0x126   : > { %v622_v47 = vpop.f32.mrf.mxu1  ;;  %v979_v60 = vrot.slane %v877_v44, 2 }
 0x127   : > { %v724_v49 = vrot.slane %v622_v47, 1  ;;  %v3399_v50 = vpop.f32.mrf.mxu0  ;;  %3602 = vmatmul.mubr.msk.bf16.gmra.mxu0 %vm306_vm1, %v4197_v2 }
 0x128   : > { %v3365_v28 = vpop.f32.mrf.mxu1  ;;  %3568 = vmatmul.mubr.msk.bf16.gmra.mxu1 %vm306_vm1, %v4197_v2  ;;  %3605 = vmatprep.mubr.msk.bf16.mxu0 %vm306_vm1, %v4200_v4  ;;  %v980_v32 = vsel %vm957_vm2, %v978_v46, %v979_v60  ;;  %v982_v51 = vsel %vm957_vm2, %v979_v60, %v981_v45  ;;  %v986_v8 = vrot.slane %v3399_v50, 2 }
 0x129   : > { %v725_v9 = vsel %vm702_vm3, %v723_v48, %v724_v49  ;;  %v727_v15 = vsel %vm702_vm3, %v724_v49, %v726_v56  ;;  %v889_v52 = vpop.f32.mrf.mxu0  ;;  %3571 = vmatprep.mubr.msk.bf16.mxu1 %vm306_vm1, %v4200_v4  ;;  %v731_v26 = vrot.slane %v3365_v28, 1 }
 0x12a   : > { %v634_v61 = vpop.f32.mrf.mxu1  ;;  %v767_v62 = vadd.f32 %v725_v9, %v4194_v0  ;;  %v768_v2 = vadd.f32 %v727_v15, %v4204_v6  ;;  %v983_v21 = vrot.slane %v889_v52, 2 }
 0x12b   : > { %v3400_v1 = vpop.f32.mrf.mxu0  ;;  %v728_v58 = vrot.slane %v634_v61, 1 }
 0x12c   : > { %v3366_v3 = vpop.f32.mrf.mxu1  ;;  %v4357_v53 = vadd.f32 %v980_v32, %v767_v62  ;;  %v4359_v57 = vadd.f32 %v982_v51, %v768_v2 }
 0x12d   : > { %v892_v7 = vpop.f32.mrf.mxu0 }
 0x12e   : > { %v637_v23 = vpop.f32.mrf.mxu1  ;;  %v984_v54 = vrot.slane %v892_v7, 2 }
 0x12f   : > { %v729_v27 = vrot.slane %v637_v23, 1  ;;  %v3403_v4 = vpop.f32.mrf.mxu0  ;;  %3606 = vmatmul.mubr.msk.bf16.gmra.mxu0 %vm306_vm1, %v4219_v12 }
 0x130   : > { %v3369_v0 = vpop.f32.mrf.mxu1  ;;  %3572 = vmatmul.mubr.msk.bf16.gmra.mxu1 %vm306_vm1, %v4219_v12  ;;  %3609 = vmatprep.mubr.msk.bf16.mxu0 %vm306_vm1, %v4222_v14  ;;  %v985_v6 = vsel %vm957_vm2, %v983_v21, %v984_v54  ;;  %v987_v30 = vsel %vm957_vm2, %v984_v54, %v986_v8  ;;  %v991_v59 = vrot.slane %v3403_v4, 2 }
 0x131   : > { %v730_v31 = vsel %vm702_vm3, %v728_v58, %v729_v27  ;;  %v732_v63 = vsel %vm702_vm3, %v729_v27, %v731_v26  ;;  %v904_v19 = vpop.f32.mrf.mxu0  ;;  %3575 = vmatprep.mubr.msk.bf16.mxu1 %vm306_vm1, %v4222_v14  ;;  %v736_v45 = vrot.slane %v3369_v0, 1 }
 0x132   : > { %v649_v24 = vpop.f32.mrf.mxu1  ;;  %v769_v5 = vadd.f32 %v730_v31, %v4216_v10  ;;  %v770_v12 = vadd.f32 %v732_v63, %v4226_v16  ;;  %v988_v39 = vrot.slane %v904_v19, 2 }
 0x133   : > { %v3404_v34 = vpop.f32.mrf.mxu0  ;;  %v733_v46 = vrot.slane %v649_v24, 1 }
 0x134   : > { %v3370_v35 = vpop.f32.mrf.mxu1  ;;  %v4375_v36 = vadd.f32 %v985_v6, %v769_v5  ;;  %v4377_v37 = vadd.f32 %v987_v30, %v770_v12 }
 0x135   : > { %v907_v38 = vpop.f32.mrf.mxu0 }
 0x136   : > { %v652_v55 = vpop.f32.mrf.mxu1  ;;  %v989_v44 = vrot.slane %v907_v38, 2 }
 0x137   : > { %v734_v47 = vrot.slane %v652_v55, 1  ;;  %v3407_v14 = vpop.f32.mrf.mxu0  ;;  %3610 = vmatmul.mubr.msk.bf16.gmra.mxu0 %vm306_vm1, %v4241_v22 }
 0x138   : > { %v3373_v10 = vpop.f32.mrf.mxu1  ;;  %3576 = vmatmul.mubr.msk.bf16.gmra.mxu1 %vm306_vm1, %v4241_v22  ;;  %v990_v16 = vsel %vm957_vm2, %v988_v39, %v989_v44  ;;  %v992_v60 = vsel %vm957_vm2, %v989_v44, %v991_v59  ;;  %v996_v61 = vrot.slane %v3407_v14, 2 }
 0x139   : > { %v735_v56 = vsel %vm702_vm3, %v733_v46, %v734_v47  ;;  %v737_v48 = vsel %vm702_vm3, %v734_v47, %v736_v45  ;;  %v919_v49 = vpop.f32.mrf.mxu0  ;;  %v741_v3 = vrot.slane %v3373_v10, 1 }
 0x13a   : > { %v664_v50 = vpop.f32.mrf.mxu1  ;;  %v771_v28 = vadd.f32 %v735_v56, %v4238_v20  ;;  %v772_v32 = vadd.f32 %v737_v48, %v4245_v25  ;;  %v993_v62 = vrot.slane %v919_v49, 2 }
 0x13b   : > { %v3408_v51 = vpop.f32.mrf.mxu0  ;;  %v738_v7 = vrot.slane %v664_v50, 1 }
 0x13c   : > { %v3374_v9 = vpop.f32.mrf.mxu1  ;;  %v4389_v15 = vadd.f32 %v990_v16, %v771_v28  ;;  %v4391_v52 = vadd.f32 %v992_v60, %v772_v32 }
 0x13d   : > { %v922_v22 = vpop.f32.mrf.mxu0 }
 0x13e   : > { %v667_v2 = vpop.f32.mrf.mxu1  ;;  %v994_v1 = vrot.slane %v922_v22, 2 }
 0x13f   : > { %v739_v8 = vrot.slane %v667_v2, 1  ;;  %v3447_v21 = vpop.f32.mrf.mxu0 }
 0x140   : > { %v3413_v23 = vpop.f32.mrf.mxu1  ;;  %v995_v20 = vsel %vm957_vm2, %v993_v62, %v994_v1  ;;  %v997_v25 = vsel %vm957_vm2, %v994_v1, %v996_v61  ;;  %v1545_v5 = vrot.slane %v3447_v21, 1 }
 0x141   : > { %v740_v54 = vsel %vm702_vm3, %v738_v7, %v739_v8  ;;  %v742_v26 = vsel %vm702_vm3, %v739_v8, %v741_v3  ;;  %v1399_v58 = vpop.f32.mrf.mxu0 }
 0x142   : > { %v1233_v27 = vpop.f32.mrf.mxu1  ;;  %v773_v4 = vadd.f32 %v740_v54, %v4257_v29  ;;  %v774_v0 = vadd.f32 %v742_v26, %v4261_v33  ;;  %v1542_v12 = vrot.slane %v1399_v58, 1 }
 0x143   : > { %v1344_v6 = vadd.f32 %v1233_v27, %v4285_v11  ;;  %v3448_v30 = vpop.f32.mrf.mxu0 }
 0x144   : > { %v3414_v31 = vpop.f32.mrf.mxu1  ;;  %v4400_v63 = vadd.f32 %v995_v20, %v773_v4  ;;  %v4402_v19 = vadd.f32 %v997_v25, %v774_v0 }
 0x145   : > { %v1402_v24 = vpop.f32.mrf.mxu0 }
 0x146   : > { %v1236_v34 = vpop.f32.mrf.mxu1  ;;  %v1543_v35 = vrot.slane %v1402_v24, 1 }
 0x147   : > { %v1345_v38 = vadd.f32 %v1236_v34, %v4287_v13  ;;  %v3451_v59 = vpop.f32.mrf.mxu0 }
 0x148   : > { %v1544_v29 = vsel %vm702_vm3, %v1542_v12, %v1543_v35  ;;  %v1546_v33 = vsel %vm702_vm3, %v1543_v35, %v1545_v5  ;;  %v3417_v39 = vpop.f32.mrf.mxu1  ;;  %v1550_v16 = vrot.slane %v3451_v59, 1 }
 0x149   : > { %v4407_v11 = vadd.f32 %v1544_v29, %v1344_v6  ;;  %v1414_v55 = vpop.f32.mrf.mxu0  ;;  %v4409_v44 = vadd.f32 %v1546_v33, %v1345_v38 }
 0x14a   : > { %v1247_v45 = vpop.f32.mrf.mxu1  ;;  %v1547_v60 = vrot.slane %v1414_v55, 1 }
 0x14b   : > { %v1346_v46 = vadd.f32 %v1247_v45, %v4303_v42  ;;  %v3452_v47 = vpop.f32.mrf.mxu0 }
 0x14c   : > { %v3418_v14 = vpop.f32.mrf.mxu1 }
 0x14d   : > { %v1417_v10 = vpop.f32.mrf.mxu0 }
 0x14e   : > { %v1250_v13 = vpop.f32.mrf.mxu1  ;;  %v1548_v56 = vrot.slane %v1417_v10, 1 }
 0x14f   : > { %v1347_v48 = vadd.f32 %v1250_v13, %v4305_v43  ;;  %v3455_v49 = vpop.f32.mrf.mxu0 }
 0x150   : > { %v1549_v50 = vsel %vm702_vm3, %v1547_v60, %v1548_v56  ;;  %v1551_v28 = vsel %vm702_vm3, %v1548_v56, %v1550_v16  ;;  %v3421_v32 = vpop.f32.mrf.mxu1  ;;  %v1555_v3 = vrot.slane %v3455_v49, 1 }
 0x151   : > { %v4415_v51 = vadd.f32 %v1549_v50, %v1346_v46  ;;  %v1429_v9 = vpop.f32.mrf.mxu0  ;;  %v4417_v22 = vadd.f32 %v1551_v28, %v1347_v48 }
 0x152   : > { %v1261_v42 = vpop.f32.mrf.mxu1  ;;  %v1552_v7 = vrot.slane %v1429_v9, 1 }
 0x153   : > { %v1348_v61 = vadd.f32 %v1261_v42, %v4321_v17  ;;  %v3456_v62 = vpop.f32.mrf.mxu0 }
 0x154   : > { %v3422_v2 = vpop.f32.mrf.mxu1 }
 0x155   : > { %v1432_v1 = vpop.f32.mrf.mxu0 }
 0x156   : > { %v1264_v43 = vpop.f32.mrf.mxu1  ;;  %v1553_v8 = vrot.slane %v1432_v1, 1 }
 0x157   : > { %v1349_v21 = vadd.f32 %v1264_v43, %v4323_v18  ;;  %v3459_v23 = vpop.f32.mrf.mxu0 }
 0x158   : > { %v1554_v20 = vsel %vm702_vm3, %v1552_v7, %v1553_v8  ;;  %v1556_v25 = vsel %vm702_vm3, %v1553_v8, %v1555_v3  ;;  %v3425_v54 = vpop.f32.mrf.mxu1  ;;  %v1560_v31 = vrot.slane %v3459_v23, 1 }
 0x159   : > { %v4423_v26 = vadd.f32 %v1554_v20, %v1348_v61  ;;  %v1444_v58 = vpop.f32.mrf.mxu0  ;;  %v4425_v27 = vadd.f32 %v1556_v25, %v1349_v21 }
 0x15a   : > { %v1275_v17 = vpop.f32.mrf.mxu1  ;;  %v1557_v24 = vrot.slane %v1444_v58, 1 }
 0x15b   : > { %v1350_v4 = vadd.f32 %v1275_v17, %v4339_v40  ;;  %v3460_v0 = vpop.f32.mrf.mxu0 }
 0x15c   : > { %v3426_v6 = vpop.f32.mrf.mxu1 }
 0x15d   : > { %v1447_v30 = vpop.f32.mrf.mxu0 }
 0x15e   : > { %v1278_v18 = vpop.f32.mrf.mxu1  ;;  %v1558_v5 = vrot.slane %v1447_v30, 1 }
 0x15f   : > { %v1351_v12 = vadd.f32 %v1278_v18, %v4341_v41  ;;  %v3463_v34 = vpop.f32.mrf.mxu0 }
 0x160   : > { %v1559_v35 = vsel %vm702_vm3, %v1557_v24, %v1558_v5  ;;  %v1561_v38 = vsel %vm702_vm3, %v1558_v5, %v1560_v31  ;;  %v3429_v59 = vpop.f32.mrf.mxu1  ;;  %v1565_v14 = vrot.slane %v3463_v34, 1 }
 0x161   : > { %v4431_v29 = vadd.f32 %v1559_v35, %v1350_v4  ;;  %v1459_v33 = vpop.f32.mrf.mxu0  ;;  %v4433_v39 = vadd.f32 %v1561_v38, %v1351_v12 }
 0x162   : > { %v1289_v40 = vpop.f32.mrf.mxu1  ;;  %v1562_v10 = vrot.slane %v1459_v33, 1 }
 0x163   : > { %v1352_v55 = vadd.f32 %v1289_v40, %v4357_v53  ;;  %v3464_v45 = vpop.f32.mrf.mxu0 }
 0x164   : > { %v3430_v46 = vpop.f32.mrf.mxu1 }
 0x165   : > { %v1462_v47 = vpop.f32.mrf.mxu0 }
 0x166   : > { %v1292_v41 = vpop.f32.mrf.mxu1  ;;  %v1563_v16 = vrot.slane %v1462_v47, 1 }
 0x167   : > { %v1353_v60 = vadd.f32 %v1292_v41, %v4359_v57  ;;  %v3467_v13 = vpop.f32.mrf.mxu0 }
 0x168   : > { %v1564_v56 = vsel %vm702_vm3, %v1562_v10, %v1563_v16  ;;  %v1566_v48 = vsel %vm702_vm3, %v1563_v16, %v1565_v14  ;;  %v3433_v49 = vpop.f32.mrf.mxu1  ;;  %v1570_v2 = vrot.slane %v3467_v13, 1 }
 0x169   : > { %v4439_v50 = vadd.f32 %v1564_v56, %v1352_v55  ;;  %v1474_v28 = vpop.f32.mrf.mxu0  ;;  %v4441_v32 = vadd.f32 %v1566_v48, %v1353_v60 }
 0x16a   : > { %v1303_v53 = vpop.f32.mrf.mxu1  ;;  %v1567_v1 = vrot.slane %v1474_v28, 1 }
 0x16b   : > { %v1354_v9 = vadd.f32 %v1303_v53, %v4375_v36  ;;  %v3468_v42 = vpop.f32.mrf.mxu0 }
 0x16c   : > { %v3434_v61 = vpop.f32.mrf.mxu1 }
 0x16d   : > { %v1477_v62 = vpop.f32.mrf.mxu0 }
 0x16e   : > { %v1306_v57 = vpop.f32.mrf.mxu1  ;;  %v1568_v3 = vrot.slane %v1477_v62, 1 }
 0x16f   : > { %v1355_v7 = vadd.f32 %v1306_v57, %v4377_v37  ;;  %v3471_v43 = vpop.f32.mrf.mxu0 }
 0x170   : > { %v1569_v8 = vsel %vm702_vm3, %v1567_v1, %v1568_v3  ;;  %v1571_v21 = vsel %vm702_vm3, %v1568_v3, %v1570_v2  ;;  %v3437_v23 = vpop.f32.mrf.mxu1  ;;  %v1575_v6 = vrot.slane %v3471_v43, 1 }
 0x171   : > { %v4447_v20 = vadd.f32 %v1569_v8, %v1354_v9  ;;  %v1489_v25 = vpop.f32.mrf.mxu0  ;;  %v4449_v54 = vadd.f32 %v1571_v21, %v1355_v7 }
 0x172   : > { %v1317_v36 = vpop.f32.mrf.mxu1  ;;  %v1572_v30 = vrot.slane %v1489_v25, 1 }
 0x173   : > { %v1356_v58 = vadd.f32 %v1317_v36, %v4389_v15  ;;  %v3472_v17 = vpop.f32.mrf.mxu0 }
 0x174   : > { %v3438_v4 = vpop.f32.mrf.mxu1 }
 0x175   : > { %v1492_v0 = vpop.f32.mrf.mxu0 }
 0x176   : > { %v1320_v37 = vpop.f32.mrf.mxu1  ;;  %v1573_v31 = vrot.slane %v1492_v0, 1 }
 0x177   : > { %v1357_v24 = vadd.f32 %v1320_v37, %v4391_v52  ;;  %v3475_v18 = vpop.f32.mrf.mxu0 }
 0x178   : > { %v1574_v5 = vsel %vm702_vm3, %v1572_v30, %v1573_v31  ;;  %v1576_v12 = vsel %vm702_vm3, %v1573_v31, %v1575_v6  ;;  %v3441_v34 = vpop.f32.mrf.mxu1  ;;  %v1580_v46 = vrot.slane %v3475_v18, 1 }
 0x179   : > { %v4455_v35 = vadd.f32 %v1574_v5, %v1356_v58  ;;  %v1504_v38 = vpop.f32.mrf.mxu0  ;;  %v4457_v59 = vadd.f32 %v1576_v12, %v1357_v24 }
 0x17a   : > { %v1331_v15 = vpop.f32.mrf.mxu1  ;;  %v1577_v47 = vrot.slane %v1504_v38, 1 }
 0x17b   : > { %v1358_v33 = vadd.f32 %v1331_v15, %v4400_v63  ;;  %v3476_v40 = vpop.f32.mrf.mxu0 }
 0x17c   : > { %v3442_v55 = vpop.f32.mrf.mxu1 }
 0x17d   : > { %v1507_v45 = vpop.f32.mrf.mxu0 }
 0x17e   : > { %v1334_v52 = vpop.f32.mrf.mxu1  ;;  %v1578_v14 = vrot.slane %v1507_v45, 1 }
 0x17f   : > { %v1359_v10 = vadd.f32 %v1334_v52, %v4402_v19  ;;  %v3515_v41 = vpop.f32.mrf.mxu0 }
 0x180   : > { %v1579_v16 = vsel %vm702_vm3, %v1577_v47, %v1578_v14  ;;  %v1581_v60 = vsel %vm702_vm3, %v1578_v14, %v1580_v46  ;;  %v3481_v13 = vpop.f32.mrf.mxu1 }
 0x181   : > { %v4463_v56 = vadd.f32 %v1579_v16, %v1358_v33  ;;  %v2071_v48 = vpop.f32.mrf.mxu0  ;;  %v4465_v49 = vadd.f32 %v1581_v60, %v1359_v10  ;;  %v1799_v61 = vrot.slane %v3481_v13, 2 }
 0x182   : > { %v1653_v63 = vpop.f32.mrf.mxu1 }
 0x183   : > { %v3516_v28 = vpop.f32.mrf.mxu0  ;;  %v1796_v62 = vrot.slane %v1653_v63, 2 }
 0x184   : > { %v3482_v53 = vpop.f32.mrf.mxu1 }
 0x185   : > { %v2074_v9 = vpop.f32.mrf.mxu0 }
 0x186   : > { %v1656_v42 = vpop.f32.mrf.mxu1 }
 0x187   : > { %v1797_v2 = vrot.slane %v1656_v42, 2  ;;  %v3519_v19 = vpop.f32.mrf.mxu0 }
 0x188   : > { %v3485_v1 = vpop.f32.mrf.mxu1 }
 0x189   : > { %v1798_v57 = vsel %vm957_vm2, %v1796_v62, %v1797_v2  ;;  %v1800_v3 = vsel %vm957_vm2, %v1797_v2, %v1799_v61  ;;  %v2085_v7 = vpop.f32.mrf.mxu0  ;;  %v1804_v0 = vrot.slane %v3485_v1, 2 }
 0x18a   : > { %v1852_v43 = vadd.f32 %v1798_v57, %v4407_v11  ;;  %v1853_v8 = vadd.f32 %v1800_v3, %v4409_v44  ;;  %v1668_v21 = vpop.f32.mrf.mxu1 }
 0x18b   : > { %v3520_v23 = vpop.f32.mrf.mxu0  ;;  %v1801_v6 = vrot.slane %v1668_v21, 2 }
 0x18c   : > { %v4471_v25 = vadd.f32 %v2074_v9, %v1853_v8  ;;  %v3486_v36 = vpop.f32.mrf.mxu1  ;;  %v4473_v58 = vadd.f32 %v2071_v48, %v1852_v43 }
 0x18d   : > { %v2088_v17 = vpop.f32.mrf.mxu0 }
 0x18e   : > { %v1671_v4 = vpop.f32.mrf.mxu1 }
 0x18f   : > { %v1802_v30 = vrot.slane %v1671_v4, 2  ;;  %v3523_v37 = vpop.f32.mrf.mxu0 }
 0x190   : > { %v3489_v31 = vpop.f32.mrf.mxu1 }
 0x191   : > { %v1803_v24 = vsel %vm957_vm2, %v1801_v6, %v1802_v30  ;;  %v1805_v11 = vsel %vm957_vm2, %v1802_v30, %v1804_v0  ;;  %v2099_v18 = vpop.f32.mrf.mxu0  ;;  %v1809_v45 = vrot.slane %v3489_v31, 2 }
 0x192   : > { %v1854_v44 = vadd.f32 %v1803_v24, %v4415_v51  ;;  %v1855_v5 = vadd.f32 %v1805_v11, %v4417_v22  ;;  %v1683_v12 = vpop.f32.mrf.mxu1 }
 0x193   : > { %v3524_v34 = vpop.f32.mrf.mxu0  ;;  %v1806_v46 = vrot.slane %v1683_v12, 2 }
 0x194   : > { %v4479_v38 = vadd.f32 %v2088_v17, %v1855_v5  ;;  %v3490_v15 = vpop.f32.mrf.mxu1  ;;  %v4481_v33 = vadd.f32 %v2085_v7, %v1854_v44 }
 0x195   : > { %v2102_v40 = vpop.f32.mrf.mxu0 }
 0x196   : > { %v1686_v55 = vpop.f32.mrf.mxu1 }
 0x197   : > { %v1807_v47 = vrot.slane %v1686_v55, 2  ;;  %v3527_v52 = vpop.f32.mrf.mxu0 }
 0x198   : > { %v3493_v14 = vpop.f32.mrf.mxu1 }
 0x199   : > { %v1808_v10 = vsel %vm957_vm2, %v1806_v46, %v1807_v47  ;;  %v1810_v51 = vsel %vm957_vm2, %v1807_v47, %v1809_v45  ;;  %v2113_v41 = vpop.f32.mrf.mxu0  ;;  %v1814_v42 = vrot.slane %v3493_v14, 2 }
 0x19a   : > { %v1856_v22 = vadd.f32 %v1808_v10, %v4423_v26  ;;  %v1857_v16 = vadd.f32 %v1810_v51, %v4425_v27  ;;  %v1698_v60 = vpop.f32.mrf.mxu1 }
 0x19b   : > { %v3528_v13 = vpop.f32.mrf.mxu0  ;;  %v1811_v61 = vrot.slane %v1698_v60, 2 }
 0x19c   : > { %v4487_v48 = vadd.f32 %v2102_v40, %v1857_v16  ;;  %v3494_v63 = vpop.f32.mrf.mxu1  ;;  %v4489_v28 = vadd.f32 %v2099_v18, %v1856_v22 }
 0x19d   : > { %v2116_v53 = vpop.f32.mrf.mxu0 }
 0x19e   : > { %v1701_v9 = vpop.f32.mrf.mxu1 }
 0x19f   : > { %v1812_v62 = vrot.slane %v1701_v9, 2  ;;  %v3531_v2 = vpop.f32.mrf.mxu0 }
 0x1a0   : > { %v3497_v19 = vpop.f32.mrf.mxu1 }
 0x1a1   : > { %v1813_v1 = vsel %vm957_vm2, %v1811_v61, %v1812_v62  ;;  %v1815_v26 = vsel %vm957_vm2, %v1812_v62, %v1814_v42  ;;  %v2127_v57 = vpop.f32.mrf.mxu0  ;;  %v1819_v4 = vrot.slane %v3497_v19, 2 }
 0x1a2   : > { %v1858_v27 = vadd.f32 %v1813_v1, %v4431_v29  ;;  %v1859_v3 = vadd.f32 %v1815_v26, %v4433_v39  ;;  %v1713_v7 = vpop.f32.mrf.mxu1 }
 0x1a3   : > { %v3532_v43 = vpop.f32.mrf.mxu0  ;;  %v1816_v0 = vrot.slane %v1713_v7, 2 }
 0x1a4   : > { %v4495_v8 = vadd.f32 %v2116_v53, %v1859_v3  ;;  %v3498_v21 = vpop.f32.mrf.mxu1  ;;  %v4497_v23 = vadd.f32 %v2113_v41, %v1858_v27 }
 0x1a5   : > { %v2130_v36 = vpop.f32.mrf.mxu0 }
 0x1a6   : > { %v1716_v17 = vpop.f32.mrf.mxu1 }
 0x1a7   : > { %v1817_v6 = vrot.slane %v1716_v17, 2  ;;  %v3535_v30 = vpop.f32.mrf.mxu0 }
 0x1a8   : > { %v3501_v37 = vpop.f32.mrf.mxu1 }
 0x1a9   : > { %v1818_v31 = vsel %vm957_vm2, %v1816_v0, %v1817_v6  ;;  %v1820_v29 = vsel %vm957_vm2, %v1817_v6, %v1819_v4  ;;  %v2141_v24 = vpop.f32.mrf.mxu0  ;;  %v1824_v55 = vrot.slane %v3501_v37, 2 }
 0x1aa   : > { %v1860_v39 = vadd.f32 %v1818_v31, %v4439_v50  ;;  %v1861_v11 = vadd.f32 %v1820_v29, %v4441_v32  ;;  %v1728_v18 = vpop.f32.mrf.mxu1 }
 0x1ab   : > { %v3536_v44 = vpop.f32.mrf.mxu0  ;;  %v1821_v45 = vrot.slane %v1728_v18, 2 }
 0x1ac   : > { %v4503_v5 = vadd.f32 %v2130_v36, %v1861_v11  ;;  %v3502_v12 = vpop.f32.mrf.mxu1  ;;  %v4505_v34 = vadd.f32 %v2127_v57, %v1860_v39 }
 0x1ad   : > { %v2144_v15 = vpop.f32.mrf.mxu0 }
 0x1ae   : > { %v1731_v40 = vpop.f32.mrf.mxu1 }
 0x1af   : > { %v1822_v46 = vrot.slane %v1731_v40, 2  ;;  %v3539_v47 = vpop.f32.mrf.mxu0 }
 0x1b0   : > { %v3505_v52 = vpop.f32.mrf.mxu1 }
 0x1b1   : > { %v1823_v14 = vsel %vm957_vm2, %v1821_v45, %v1822_v46  ;;  %v1825_v50 = vsel %vm957_vm2, %v1822_v46, %v1824_v55  ;;  %v2155_v10 = vpop.f32.mrf.mxu0  ;;  %v1829_v9 = vrot.slane %v3505_v52, 2 }
 0x1b2   : > { %v1862_v32 = vadd.f32 %v1823_v14, %v4447_v20  ;;  %v1863_v51 = vadd.f32 %v1825_v50, %v4449_v54  ;;  %v1743_v41 = vpop.f32.mrf.mxu1 }
 0x1b3   : > { %v3540_v22 = vpop.f32.mrf.mxu0  ;;  %v1826_v42 = vrot.slane %v1743_v41, 2 }
 0x1b4   : > { %v4511_v16 = vadd.f32 %v2144_v15, %v1863_v51  ;;  %v3506_v60 = vpop.f32.mrf.mxu1  ;;  %v4513_v13 = vadd.f32 %v2141_v24, %v1862_v32 }
 0x1b5   : > { %v2158_v63 = vpop.f32.mrf.mxu0 }
 0x1b6   : > { %v1746_v53 = vpop.f32.mrf.mxu1 }
 0x1b7   : > { %v1827_v61 = vrot.slane %v1746_v53, 2  ;;  %v3543_v62 = vpop.f32.mrf.mxu0 }
 0x1b8   : > { %v3509_v2 = vpop.f32.mrf.mxu1 }
 0x1b9   : > { %v1828_v19 = vsel %vm957_vm2, %v1826_v42, %v1827_v61  ;;  %v1830_v20 = vsel %vm957_vm2, %v1827_v61, %v1829_v9  ;;  %v2169_v1 = vpop.f32.mrf.mxu0  ;;  %v1834_v17 = vrot.slane %v3509_v2, 2 }
 0x1ba   : > { %v1864_v54 = vadd.f32 %v1828_v19, %v4455_v35  ;;  %v1865_v26 = vadd.f32 %v1830_v20, %v4457_v59  ;;  %v1758_v57 = vpop.f32.mrf.mxu1 }
 0x1bb   : > { %v3544_v27 = vpop.f32.mrf.mxu0  ;;  %v1831_v4 = vrot.slane %v1758_v57, 2 }
 0x1bc   : > { %v4519_v3 = vadd.f32 %v2158_v63, %v1865_v26  ;;  %v3510_v7 = vpop.f32.mrf.mxu1  ;;  %v4521_v43 = vadd.f32 %v2155_v10, %v1864_v54  ;;  %v4541_v63 = vld [vmem:[%s4686_s2] ss:$0 sm:$0xff] }
 0x1bd   : > { %v2172_v21 = vpop.f32.mrf.mxu0 }
 0x1be   : > { %v1761_v36 = vpop.f32.mrf.mxu1 }
 0x1bf   : > { %v1832_v0 = vrot.slane %v1761_v36, 2  ;;  %v3583_v6 = vpop.f32.mrf.mxu0 }
 0x1c0   : > { %v3549_v30 = vpop.f32.mrf.mxu1 }
 0x1c1   : > { %v1833_v37 = vsel %vm957_vm2, %v1831_v4, %v1832_v0  ;;  %v1835_v35 = vsel %vm957_vm2, %v1832_v0, %v1834_v17  ;;  %v2491_v31 = vpop.f32.mrf.mxu0  ;;  %v2383_v40 = vrot.slane %v3549_v30, 1 }
 0x1c2   : > { %v1866_v59 = vadd.f32 %v1833_v37, %v4463_v56  ;;  %v1867_v29 = vadd.f32 %v1835_v35, %v4465_v49  ;;  %v2237_v24 = vpop.f32.mrf.mxu1  ;;  %v2637_v56 = vrot.slane %v3583_v6, 2  ;;  %v2634_v14 = vrot.slane %v2491_v31, 2 }
 0x1c3   : > { %v3584_v39 = vpop.f32.mrf.mxu0  ;;  %v2380_v55 = vrot.slane %v2237_v24, 1 }
 0x1c4   : > { %v4527_v11 = vadd.f32 %v2172_v21, %v1867_v29  ;;  %v3550_v18 = vpop.f32.mrf.mxu1  ;;  %v4529_v44 = vadd.f32 %v2169_v1, %v1866_v59 }
 0x1c5   : > { %v2494_v12 = vpop.f32.mrf.mxu0 }
 0x1c6   : > { %v2240_v15 = vpop.f32.mrf.mxu1  ;;  %v2635_v46 = vrot.slane %v2494_v12, 2 }
 0x1c7   : > { %v2381_v45 = vrot.slane %v2240_v15, 1  ;;  %v3587_v47 = vpop.f32.mrf.mxu0 }
 0x1c8   : > { %v3553_v52 = vpop.f32.mrf.mxu1  ;;  %v2636_v22 = vsel %vm957_vm2, %v2634_v14, %v2635_v46  ;;  %v2638_v60 = vsel %vm957_vm2, %v2635_v46, %v2637_v56  ;;  %v2642_v21 = vrot.slane %v3587_v47, 2 }
 0x1c9   : > { %v2382_v49 = vsel %vm702_vm3, %v2380_v55, %v2381_v45  ;;  %v2384_v50 = vsel %vm702_vm3, %v2381_v45, %v2383_v40  ;;  %v2506_v10 = vpop.f32.mrf.mxu0  ;;  %v2388_v19 = vrot.slane %v3553_v52, 1 }
 0x1ca   : > { %v2436_v32 = vadd.f32 %v2382_v49, %v4473_v58  ;;  %v2437_v51 = vadd.f32 %v2384_v50, %v4471_v25  ;;  %v2252_v41 = vpop.f32.mrf.mxu1  ;;  %v2639_v36 = vrot.slane %v2506_v10, 2 }
 0x1cb   : > { %v3588_v53 = vpop.f32.mrf.mxu0  ;;  %v2385_v20 = vrot.slane %v2252_v41, 1 }
 0x1cc   : > { %v2690_v9 = vadd.f32 %v2636_v22, %v2436_v32  ;;  %v2691_v42 = vadd.f32 %v2638_v60, %v2437_v51  ;;  %v3554_v61 = vpop.f32.mrf.mxu1 }
 0x1cd   : > { %v2509_v62 = vpop.f32.mrf.mxu0 }
 0x1ce   : > { %v2713_v58 = vadd.f32 %v4541_v63, %v2690_v9  ;;  %v2714_v25 = vadd.f32 %v4541_v63, %v2691_v42  ;;  %v2255_v2 = vpop.f32.mrf.mxu1  ;;  %v2640_v54 = vrot.slane %v2509_v62, 2 }
 0x1cf   : > { %v2386_v1 = vrot.slane %v2255_v2, 1  ;;  %v3591_v26 = vpop.f32.mrf.mxu0 }
 0x1d0   : > { %v2729_v57 = vmax.f32 %v2713_v58, 0.0  ;;  %v2730_v27 = vmax.f32 %v2714_v25, 0.0  ;;  %v3557_v7 = vpop.f32.mrf.mxu1  ;;  %v2641_v35 = vsel %vm957_vm2, %v2639_v36, %v2640_v54  ;;  %v2643_v31 = vsel %vm957_vm2, %v2640_v54, %v2642_v21 }
 0x1d1   : > { %v2387_v17 = vsel %vm702_vm3, %v2385_v20, %v2386_v1  ;;  %v2389_v4 = vsel %vm702_vm3, %v2386_v1, %v2388_v19  ;;  %v2521_v0 = vpop.f32.mrf.mxu0  ;;  %v2647_v14 = vrot.slane %v3591_v26, 2 }
 0x1d2   : > { %2745 = vst [vmem:[%s4549_s7] sm:$0xff] %v2729_v57  ;;  %2746 = vst [vmem:[%s4549_s7 + $0x8] sm:$0xff] %v2730_v27  ;;  %v2438_v6 = vadd.f32 %v2387_v17, %v4481_v33  ;;  %v2439_v30 = vadd.f32 %v2389_v4, %v4479_v38  ;;  %v2267_v37 = vpop.f32.mrf.mxu1  ;;  %v2393_v33 = vrot.slane %v3557_v7, 1  ;;  %v2644_v49 = vrot.slane %v2521_v0, 2 }
 0x1d3   : > { %v3592_v59 = vpop.f32.mrf.mxu0  ;;  %v2390_v55 = vrot.slane %v2267_v37, 1 }
 0x1d4   : > { %v2692_v29 = vadd.f32 %v2641_v35, %v2438_v6  ;;  %v2693_v24 = vadd.f32 %v2643_v31, %v2439_v30  ;;  %v3558_v39 = vpop.f32.mrf.mxu1 }
 0x1d5   : > { %v2524_v18 = vpop.f32.mrf.mxu0 }
 0x1d6   : > { %v2715_v12 = vadd.f32 %v4541_v63, %v2692_v29  ;;  %v2716_v15 = vadd.f32 %v4541_v63, %v2693_v24  ;;  %v2270_v40 = vpop.f32.mrf.mxu1  ;;  %v2645_v45 = vrot.slane %v2524_v18, 2 }
 0x1d7   : > { %v2391_v38 = vrot.slane %v2270_v40, 1  ;;  %v3595_v46 = vpop.f32.mrf.mxu0 }
 0x1d8   : > { %v2731_v47 = vmax.f32 %v2715_v12, 0.0  ;;  %v2732_v52 = vmax.f32 %v2716_v15, 0.0  ;;  %v3561_v56 = vpop.f32.mrf.mxu1  ;;  %v2646_v60 = vsel %vm957_vm2, %v2644_v49, %v2645_v45  ;;  %v2648_v53 = vsel %vm957_vm2, %v2645_v45, %v2647_v14 }
 0x1d9   : > { %v2392_v50 = vsel %vm702_vm3, %v2390_v55, %v2391_v38  ;;  %v2394_v10 = vsel %vm702_vm3, %v2391_v38, %v2393_v33  ;;  %v2536_v32 = vpop.f32.mrf.mxu0  ;;  %v2652_v7 = vrot.slane %v3595_v46, 2 }
 0x1da   : > { %2747 = vst [vmem:[%s4549_s7 + $0x10] sm:$0xff] %v2731_v47  ;;  %2748 = vst [vmem:[%s4549_s7 + $0x18] sm:$0xff] %v2732_v52  ;;  %v2440_v51 = vadd.f32 %v2392_v50, %v4489_v28  ;;  %v2441_v41 = vadd.f32 %v2394_v10, %v4487_v48  ;;  %v2282_v22 = vpop.f32.mrf.mxu1  ;;  %v2398_v28 = vrot.slane %v3561_v56, 1  ;;  %v2649_v21 = vrot.slane %v2536_v32, 2 }
 0x1db   : > { %v3596_v9 = vpop.f32.mrf.mxu0  ;;  %v2395_v20 = vrot.slane %v2282_v22, 1 }
 0x1dc   : > { %v2694_v42 = vadd.f32 %v2646_v60, %v2440_v51  ;;  %v2695_v61 = vadd.f32 %v2648_v53, %v2441_v41  ;;  %v3562_v62 = vpop.f32.mrf.mxu1 }
 0x1dd   : > { %v2539_v58 = vpop.f32.mrf.mxu0 }
 0x1de   : > { %v2717_v25 = vadd.f32 %v4541_v63, %v2694_v42  ;;  %v2718_v2 = vadd.f32 %v4541_v63, %v2695_v61  ;;  %v2285_v19 = vpop.f32.mrf.mxu1  ;;  %v2650_v1 = vrot.slane %v2539_v58, 2 }
 0x1df   : > { %v2396_v48 = vrot.slane %v2285_v19, 1  ;;  %v3599_v54 = vpop.f32.mrf.mxu0 }
 0x1e0   : > { %v2733_v26 = vmax.f32 %v2717_v25, 0.0  ;;  %v2734_v57 = vmax.f32 %v2718_v2, 0.0  ;;  %v3565_v27 = vpop.f32.mrf.mxu1  ;;  %v2651_v37 = vsel %vm957_vm2, %v2649_v21, %v2650_v1  ;;  %v2653_v35 = vsel %vm957_vm2, %v2650_v1, %v2652_v7 }
 0x1e1   : > { %v2397_v36 = vsel %vm702_vm3, %v2395_v20, %v2396_v48  ;;  %v2399_v17 = vsel %vm702_vm3, %v2396_v48, %v2398_v28  ;;  %v2551_v4 = vpop.f32.mrf.mxu0  ;;  %v2657_v47 = vrot.slane %v3599_v54, 2 }
 0x1e2   : > { %2749 = vst [vmem:[%s4549_s7 + $0x20] sm:$0xff] %v2733_v26  ;;  %2750 = vst [vmem:[%s4549_s7 + $0x28] sm:$0xff] %v2734_v57  ;;  %v2442_v0 = vadd.f32 %v2397_v36, %v4497_v23  ;;  %v2443_v6 = vadd.f32 %v2399_v17, %v4495_v8  ;;  %v2297_v30 = vpop.f32.mrf.mxu1  ;;  %v2403_v23 = vrot.slane %v3565_v27, 1  ;;  %v2654_v52 = vrot.slane %v2551_v4, 2 }
 0x1e3   : > { %v3600_v31 = vpop.f32.mrf.mxu0  ;;  %v2400_v40 = vrot.slane %v2297_v30, 1 }
 0x1e4   : > { %v2696_v59 = vadd.f32 %v2651_v37, %v2442_v0  ;;  %v2697_v29 = vadd.f32 %v2653_v35, %v2443_v6  ;;  %v3566_v24 = vpop.f32.mrf.mxu1 }
 0x1e5   : > { %v2554_v39 = vpop.f32.mrf.mxu0 }
 0x1e6   : > { %v2719_v18 = vadd.f32 %v4541_v63, %v2696_v59  ;;  %v2720_v12 = vadd.f32 %v4541_v63, %v2697_v29  ;;  %v2300_v15 = vpop.f32.mrf.mxu1  ;;  %v2655_v33 = vrot.slane %v2554_v39, 2 }
 0x1e7   : > { %v2401_v8 = vrot.slane %v2300_v15, 1  ;;  %v3603_v55 = vpop.f32.mrf.mxu0 }
 0x1e8   : > { %v2735_v38 = vmax.f32 %v2719_v18, 0.0  ;;  %v2736_v45 = vmax.f32 %v2720_v12, 0.0  ;;  %v3569_v46 = vpop.f32.mrf.mxu1  ;;  %v2656_v51 = vsel %vm957_vm2, %v2654_v52, %v2655_v33  ;;  %v2658_v41 = vsel %vm957_vm2, %v2655_v33, %v2657_v47 }
 0x1e9   : > { %v2402_v56 = vsel %vm702_vm3, %v2400_v40, %v2401_v8  ;;  %v2404_v14 = vsel %vm702_vm3, %v2401_v8, %v2403_v23  ;;  %v2566_v49 = vpop.f32.mrf.mxu0  ;;  %v2662_v1 = vrot.slane %v3603_v55, 2 }
 0x1ea   : > { %2751 = vst [vmem:[%s4549_s7 + $0x30] sm:$0xff] %v2735_v38  ;;  %2752 = vst [vmem:[%s4549_s7 + $0x38] sm:$0xff] %v2736_v45  ;;  %v2444_v50 = vadd.f32 %v2402_v56, %v4505_v34  ;;  %v2445_v10 = vadd.f32 %v2404_v14, %v4503_v5  ;;  %v2312_v32 = vpop.f32.mrf.mxu1  ;;  %v2408_v34 = vrot.slane %v3569_v46, 1  ;;  %v2659_v54 = vrot.slane %v2566_v49, 2 }
 0x1eb   : > { %v3604_v22 = vpop.f32.mrf.mxu0  ;;  %v2405_v25 = vrot.slane %v2312_v32, 1 }
 0x1ec   : > { %v2698_v60 = vadd.f32 %v2656_v51, %v2444_v50  ;;  %v2699_v53 = vadd.f32 %v2658_v41, %v2445_v10  ;;  %v3570_v9 = vpop.f32.mrf.mxu1 }
 0x1ed   : > { %v2569_v42 = vpop.f32.mrf.mxu0 }
 0x1ee   : > { %v2721_v61 = vadd.f32 %v4541_v63, %v2698_v60  ;;  %v2722_v62 = vadd.f32 %v4541_v63, %v2699_v53  ;;  %v2315_v58 = vpop.f32.mrf.mxu1  ;;  %v2660_v2 = vrot.slane %v2569_v42, 2 }
 0x1ef   : > { %v2406_v5 = vrot.slane %v2315_v58, 1  ;;  %v3607_v19 = vpop.f32.mrf.mxu0 }
 0x1f0   : > { %v2737_v28 = vmax.f32 %v2721_v61, 0.0  ;;  %v2738_v20 = vmax.f32 %v2722_v62, 0.0  ;;  %v3573_v48 = vpop.f32.mrf.mxu1  ;;  %v2661_v17 = vsel %vm957_vm2, %v2659_v54, %v2660_v2  ;;  %v2663_v4 = vsel %vm957_vm2, %v2660_v2, %v2662_v1 }
 0x1f1   : > { %v2407_v26 = vsel %vm702_vm3, %v2405_v25, %v2406_v5  ;;  %v2409_v57 = vsel %vm702_vm3, %v2406_v5, %v2408_v34  ;;  %v2581_v27 = vpop.f32.mrf.mxu0  ;;  %v2667_v40 = vrot.slane %v3607_v19, 2 }
 0x1f2   : > { %2753 = vst [vmem:[%s4549_s7 + $0x40] sm:$0xff] %v2737_v28  ;;  %2754 = vst [vmem:[%s4549_s7 + $0x48] sm:$0xff] %v2738_v20  ;;  %v2446_v7 = vadd.f32 %v2407_v26, %v4513_v13  ;;  %v2447_v21 = vadd.f32 %v2409_v57, %v4511_v16  ;;  %v2327_v36 = vpop.f32.mrf.mxu1  ;;  %v2413_v13 = vrot.slane %v3573_v48, 1  ;;  %v2664_v8 = vrot.slane %v2581_v27, 2 }
 0x1f3   : > { %v3608_v0 = vpop.f32.mrf.mxu0  ;;  %v2410_v24 = vrot.slane %v2327_v36, 1 }
 0x1f4   : > { %v2700_v6 = vadd.f32 %v2661_v17, %v2446_v7  ;;  %v2701_v30 = vadd.f32 %v2663_v4, %v2447_v21  ;;  %v3574_v37 = vpop.f32.mrf.mxu1 }
 0x1f5   : > { %v2584_v35 = vpop.f32.mrf.mxu0 }
 0x1f6   : > { %v2723_v31 = vadd.f32 %v4541_v63, %v2700_v6  ;;  %v2724_v59 = vadd.f32 %v4541_v63, %v2701_v30  ;;  %v2330_v29 = vpop.f32.mrf.mxu1  ;;  %v2665_v39 = vrot.slane %v2584_v35, 2 }
 0x1f7   : > { %v2411_v16 = vrot.slane %v2330_v29, 1  ;;  %v3611_v18 = vpop.f32.mrf.mxu0 }
 0x1f8   : > { %v2739_v12 = vmax.f32 %v2723_v31, 0.0  ;;  %v2740_v15 = vmax.f32 %v2724_v59, 0.0  ;;  %v3577_v23 = vpop.f32.mrf.mxu1  ;;  %v2666_v52 = vsel %vm957_vm2, %v2664_v8, %v2665_v39  ;;  %v2668_v56 = vsel %vm957_vm2, %v2665_v39, %v2667_v40 }
 0x1f9   : > { %v2412_v33 = vsel %vm702_vm3, %v2410_v24, %v2411_v16  ;;  %v2414_v55 = vsel %vm702_vm3, %v2411_v16, %v2413_v13  ;;  %v2596_v38 = vpop.f32.mrf.mxu0  ;;  %v2672_v61 = vrot.slane %v3611_v18, 2 }
 0x1fa   : > { %2755 = vst [vmem:[%s4549_s7 + $0x50] sm:$0xff] %v2739_v12  ;;  %2756 = vst [vmem:[%s4549_s7 + $0x58] sm:$0xff] %v2740_v15  ;;  %v2448_v45 = vadd.f32 %v2412_v33, %v4521_v43  ;;  %v2449_v46 = vadd.f32 %v2414_v55, %v4519_v3  ;;  %v2342_v47 = vpop.f32.mrf.mxu1  ;;  %v2418_v3 = vrot.slane %v3577_v23, 1  ;;  %v2669_v62 = vrot.slane %v2596_v38, 2 }
 0x1fb   : > { %v3612_v14 = vpop.f32.mrf.mxu0  ;;  %v2415_v22 = vrot.slane %v2342_v47, 1 }
 0x1fc   : > { %v2702_v49 = vadd.f32 %v2666_v52, %v2448_v45  ;;  %v2703_v50 = vadd.f32 %v2668_v56, %v2449_v46  ;;  %v3578_v10 = vpop.f32.mrf.mxu1 }
 0x1fd   : > { %v2599_v32 = vpop.f32.mrf.mxu0 }
 0x1fe   : > { %v2725_v51 = vadd.f32 %v4541_v63, %v2702_v49  ;;  %v2726_v41 = vadd.f32 %v4541_v63, %v2703_v50  ;;  %v2345_v43 = vpop.f32.mrf.mxu1  ;;  %v2670_v53 = vrot.slane %v2599_v32, 2 }
 0x1ff   : > { %v2416_v60 = vrot.slane %v2345_v43, 1 }
 0x200   : > { %v2741_v9 = vmax.f32 %v2725_v51, 0.0  ;;  %v2742_v42 = vmax.f32 %v2726_v41, 0.0  ;;  %v2671_v2 = vsel %vm957_vm2, %v2669_v62, %v2670_v53  ;;  %v2673_v19 = vsel %vm957_vm2, %v2670_v53, %v2672_v61 }
 0x201   : > { %v2417_v58 = vsel %vm702_vm3, %v2415_v22, %v2416_v60  ;;  %v2419_v34 = vsel %vm702_vm3, %v2416_v60, %v2418_v3 }
 0x202   : > { %2757 = vst [vmem:[%s4549_s7 + $0x60] sm:$0xff] %v2741_v9  ;;  %2758 = vst [vmem:[%s4549_s7 + $0x68] sm:$0xff] %v2742_v42  ;;  %v2450_v25 = vadd.f32 %v2417_v58, %v4529_v44  ;;  %v2451_v5 = vadd.f32 %v2419_v34, %v4527_v11 }
 0x204   : > { %v2704_v28 = vadd.f32 %v2671_v2, %v2450_v25  ;;  %v2705_v20 = vadd.f32 %v2673_v19, %v2451_v5 }
 0x206   : > { %v2727_v48 = vadd.f32 %v4541_v63, %v2704_v28  ;;  %v2728_v1 = vadd.f32 %v4541_v63, %v2705_v20 }
 0x208   : > { %v2743_v11 = vmax.f32 %v2727_v48, 0.0  ;;  %v2744_v44 = vmax.f32 %v2728_v1, 0.0 }
 0x20a   : > { %2759 = vst [vmem:[%s4549_s7 + $0x70] sm:$0xff] %v2743_v11  ;;  %2760 = vst [vmem:[%s4549_s7 + $0x78] sm:$0xff] %v2744_v44 }
 0x20b   : > { %3760 = shalt.err (!%p3757_p6)
}
 0x20c   : > { %s3761_s29 = scalar_lea.hbm %s4625_s20, 2048  ;;  %s3765_s7 = scalar_lea.hbm %s4687_s3, 8192 }
 0x20d   : > { %p3762_p8 = scmp.ne.s32.totalorder %s4625_s20, %s3761_s29  ;;  %p3766_p11 = scmp.lt.s32.totalorder %s4625_s20, %s4687_s3 }
 0x20e   : > { %p3767_p12 = scmp.lt.s32.totalorder %s3765_s7, %s3761_s29 }
 0x20f   : > { %p3763_p9 = pnand %p3762_p8, %p3917_p5 }
 0x210   : > { %p3768_p13 = por %p3767_p12, %p3766_p11 }
 0x211   : > { %p3764_p10 = pneg %p3763_p9 }
 0x213   : > { %p3769_p0 = pnand %p3768_p13, %p3764_p10 }
 0x215   : > { %3772 = shalt.err (!%p3769_p0)
}
 0x216   : > { %s3842_s16 = smov 128   ;;  %s3843_s15 = smov 8  }
 0x217   : > { %3626 = dma.vmem_to_hbm [thread:$0]  (%p3917_p5), %s4627_s10, 2048, %s4625_s20, %s4633_s23, %s3842_s16, %s3842_s16, %s3843_s15  }
 0x218 PF: > { %p3632_p1 = scmp.ge.s32.totalorder %s3839_s19, 2  ;;  %s2792_s11 = sand.u32 1, %s3811_s12  }
 0x219   : > { %s2793_s24 = scalar_lea.sflag [#allocation3], %s2792_s11 }
 0x21a   : > { %p3629_p2 = pnand %p3632_p1, %p3923_p7 }
 0x21c   : > { %p3630_p3 = pneg %p3629_p2 }
 0x21e   : > { %3806 = dma.done.wait (%p3630_p3), %s2793_s24, 2048  }
 0x21f   : > { %3808 = vsyncadd (%p3630_p3), %s2793_s24, 4294965248  ;;  %s16_s19 = sadd.s32 1, %s3839_s19   ;;  %s4690_s12 = smov %s3815_s13 }
 0x220   : > { %p13_p4 = scmp.ge.s32.totalorder %s16_s19, 6   ;;  %s4691_s13 = smov %s3819_s14 }
 0x221   : > { %s4692_s14 = smov %s3933_s5  ;;  %s4693_s15 = smov %s3831_s17 }
 0x222   : > { %s4694_s16 = smov %s3835_s18  ;;  %s4695_s17 = smov %s4698_s21 }
 0x223   : > { %s4696_s18 = smov %s4702_s22  ;;  %15 = sbr.rel (!%p13_p4) target bundleno = 5 (0x5), region = 78 }
 0x228   :  { %2798 = vsyncpa [#allocation3], 1 }
 0x229   :  { %2800 = vsyncpa [#allocation3 + $0x1], 1 }

</bundles_post_ra>
